<compile_context>
chip_gen: v7x
topology: tpu7x:2x2x1
jax: 0.10.0
libtpu: 0.0.40
codegen_flags: <defaults>
</compile_context>

<pallas_src>
import jax
import jax.numpy as jnp
from jax import lax
from jax.experimental import pallas as pl
from jax.experimental.pallas import tpu as pltpu


IN_F = 8          # input features
HID = 6           # real hidden units
HID_PAD = 8       # hidden units padded to a full 8-lane group
PACK = 16         # batch rows packed per 128-lane vreg row (16 rows * 8 features)
LANE = 128
ROW_ALIGN = 128   # batch rows per packed sublane group (PACK * 8 sublanes)


def _round_up(a, m):
    return (a + m - 1) // m * m


def mlp_kernel(xp_ref, w1_ref, b1_ref, w2_ref, b2_ref, o_ref):
    # xp_ref : (TR, 128)  packed input: lane c = (local row c//8, feature c%8)
    # w1_ref : (128, 128) block-diagonal kron(I_16, w1_pad^T)   -- VMEM resident
    # b1_ref : (1, 128)   b1_pad tiled 16x
    # w2_ref : (128, 16)  block-diagonal kron(I_16, w2_pad)
    # b2_ref : (1, 1)     SMEM scalar bias of layer 2
    # o_ref  : (TR, 16)   packed output: column m = batch row (16*r + m)
    xp = xp_ref[...]

    # Layer 1 on the MXU (VPU only does bias + relu).  HIGHEST keeps f32 accuracy.
    h = jnp.dot(xp, w1_ref[...], preferred_element_type=jnp.float32,
                precision=lax.Precision.HIGHEST)                      # (TR, 128)
    h = jnp.maximum(h + b1_ref[...], 0.0)

    # Layer 2: per-row dot with w2, also one MXU matmul (segmented lane reduce).
    o = jnp.dot(h, w2_ref[...], preferred_element_type=jnp.float32,
                precision=lax.Precision.HIGHEST)                      # (TR, 16)
    o_ref[...] = (o + b2_ref[0, 0]).astype(o_ref.dtype)


def mlp_forward(x, w1, b1, w2, b2, *, tile_rows=65536):
    """x: (B, 8) f32; torch-layout params: w1 (6,8), b1 (6,), w2 (1,6), b2 (1,)."""
    B, F = x.shape
    assert F == IN_F
    dt = x.dtype

    # --- batch alignment: zero-copy when B % 128 == 0 ---
    # TODO(synk): for a fully zero-copy path with arbitrary B, have the producer
    # pad/align the batch upstream; the jnp.pad below costs one extra HBM pass
    # only when B is not already a multiple of 128.
    b_al = _round_up(B, ROW_ALIGN)
    if b_al != B:
        x = jnp.pad(x, ((0, b_al - B), (0, 0)))
    n_rows = b_al // PACK                       # packed rows, multiple of 8
    x_p = x.reshape(n_rows, LANE)               # contiguous reshape -> bitcast, no copy

    # --- packed block-diagonal weights (tiny, built once in XLA) ---
    w1_pad = jnp.zeros((HID_PAD, IN_F), dt).at[:HID, :].set(w1)        # (8, 8)
    b1_pad = jnp.zeros((HID_PAD,), dt).at[:HID].set(b1)                # (8,)
    w2_pad = jnp.zeros((HID_PAD,), dt).at[:HID].set(w2[0])             # (8,)
    eye = jnp.eye(PACK, dtype=dt)
    w1_big = jnp.kron(eye, w1_pad.T)                                   # (128, 128)
    b1_big = jnp.tile(b1_pad, PACK).reshape(1, LANE)                   # (1, 128)
    w2_big = jnp.kron(eye, w2_pad.reshape(HID_PAD, 1))                 # (128, 16)
    b2_s = jnp.asarray(b2, dt).reshape(1, 1)                           # (1, 1) SMEM

    # --- tile selection: big tiles, v5e VMEM cap, >=2 grid steps for v7x ---
    tr = max(8, min(_round_up(max(tile_rows, PACK) // PACK, 8), 8192))  # packed rows/tile
    tr = min(tr, n_rows)
    if n_rows > 8 and tr >= n_rows:
        # keep at least 2 grid steps so v7x shards the batch over both TensorCores
        tr = _round_up((n_rows + 1) // 2, 8)
    grid = (pl.cdiv(n_rows, tr),)

    out_p = pl.pallas_call(
        mlp_kernel,
        out_shape=jax.ShapeDtypeStruct((n_rows, PACK), jnp.float32),
        grid=grid,
        in_specs=[
            # packed, lane-dense input tile; pipelined / double-buffered by Pallas
            pl.BlockSpec((tr, LANE), lambda i: (i, 0)),
            # weights / biases: constant block -> stay resident in VMEM
            pl.BlockSpec((LANE, LANE), lambda i: (0, 0)),
            pl.BlockSpec((1, LANE), lambda i: (0, 0)),
            pl.BlockSpec((LANE, PACK), lambda i: (0, 0)),
            # scalar bias of layer 2 in SMEM
            pl.BlockSpec(memory_space=pltpu.MemorySpace.SMEM),
        ],
        out_specs=pl.BlockSpec((tr, PACK), lambda i: (i, 0)),
        compiler_params=pltpu.CompilerParams(
            dimension_semantics=("parallel",),   # v7x: shard batch over 2 TCs
        ),
        cost_estimate=pl.CostEstimate(
            flops=2 * B * (IN_F * HID + HID),                       # useful flops
            transcendentals=0,
            bytes_accessed=b_al * (IN_F + 1) * 4
            + (LANE * LANE + LANE + LANE * PACK + 1) * 4,
        ),
    )(x_p, w1_big, b1_big, w2_big, b2_s)

    # (n_rows, 16) -> (b_al,) is a contiguous reshape (free); slice off padding.
    out_flat = out_p.reshape(b_al)
    if b_al != B:
        out_flat = out_flat[:B]
    return out_flat.reshape(B, 1)


def init_params(key):
    # Deterministic init mimicking nn.Linear's uniform(-1/sqrt(fan_in), 1/sqrt(fan_in))
    k1, k2, k3, k4 = jax.random.split(key, 4)
    bound1 = 1.0 / jnp.sqrt(8.0)
    bound2 = 1.0 / jnp.sqrt(6.0)
    w1 = jax.random.uniform(k1, (6, 8), jnp.float32, -bound1, bound1)   # (out, in)
    b1 = jax.random.uniform(k2, (6,), jnp.float32, -bound1, bound1)
    w2 = jax.random.uniform(k3, (1, 6), jnp.float32, -bound2, bound2)
    b2 = jax.random.uniform(k4, (1,), jnp.float32, -bound2, bound2)
    return w1, b1, w2, b2


if __name__ == "__main__":
    key = jax.random.PRNGKey(0)
    k_in, k_par = jax.random.split(key)

    # Small demo batch, deliberately NOT a multiple of 128 so the alignment pad,
    # the ragged last tile and the final slice are all exercised.  Even with the
    # default (large) tile_rows the wrapper still produces a 2-step grid here,
    # so the pipelined / megacore path is covered.
    B = 4200
    x = jax.random.normal(k_in, (B, IN_F), jnp.float32)
    w1, b1, w2, b2 = init_params(k_par)

    out = jax.block_until_ready(mlp_forward(x, w1, b1, w2, b2))

    # Reference check in plain JAX (same math as the torch forward).
    ref = jnp.maximum(x @ w1.T + b1, 0.0) @ w2.T + b2
    assert out.shape == (B, 1)
    # MXU f32 (precision=HIGHEST) matches the VPU/XLA reference to ~1e-6;
    # 1e-4 leaves margin while still catching any bf16 fallback (~5e-3 error).
    assert jnp.allclose(out, ref, atol=1e-4), "mismatch vs reference"

    print("KERNEL_OK")
</pallas_src>

<mosaic_0001>
module attributes {stable_mosaic.version = 11 : i64} {
  func.func @mlp_kernel(%arg0: i32, %arg1: memref<136x128xf32, #tpu.memory_space<vmem>>, %arg2: memref<128x128xf32, #tpu.memory_space<vmem>>, %arg3: memref<1x128xf32, #tpu.memory_space<vmem>>, %arg4: memref<128x16xf32, #tpu.memory_space<vmem>>, %arg5: memref<1x1xf32, #tpu.memory_space<smem>>, %arg6: memref<136x16xf32, #tpu.memory_space<vmem>>) attributes {dimension_semantics = [#tpu.dimension_semantics<parallel>], iteration_bounds = array<i64: 2>, scalar_prefetch = 0 : i64, scratch_operands = 0 : i64, tpu.core_type = #tpu.core_type<tc>, window_params = [{transform_indices = @transform_0, window_bounds = array<i64: 136, 128>}, {pipeline_mode = #tpu.pipeline_mode<synchronous>, transform_indices = @transform_1, window_bounds = array<i64: 128, 128>}, {pipeline_mode = #tpu.pipeline_mode<synchronous>, transform_indices = @transform_2, window_bounds = array<i64: 1, 128>}, {pipeline_mode = #tpu.pipeline_mode<synchronous>, transform_indices = @transform_3, window_bounds = array<i64: 128, 16>}, {transform_indices = @transform_4, window_bounds = array<i64: 1, 1>}, {transform_indices = @transform_5, window_bounds = array<i64: 136, 16>}]} {
    %c0 = arith.constant 0 : index
    %c0_0 = arith.constant 0 : index
    %0 = vector.load %arg1[%c0, %c0_0] : memref<136x128xf32, #tpu.memory_space<vmem>>, vector<136x128xf32>
    %c0_1 = arith.constant 0 : index
    %c0_2 = arith.constant 0 : index
    %1 = vector.load %arg2[%c0_1, %c0_2] : memref<128x128xf32, #tpu.memory_space<vmem>>, vector<128x128xf32>
    %cst = arith.constant dense<0.000000e+00> : vector<136x128xf32>
    %2 = tpu.matmul %0, %1, %cst {dimension_numbers = #tpu.dot_dimension_numbers<[1], [0], [0], [1], [0, 0, 1, 1], [], []>, precision = #tpu.contract_precision<fp32>} : vector<136x128xf32>, vector<128x128xf32>, vector<136x128xf32> -> vector<136x128xf32>
    %c0_3 = arith.constant 0 : index
    %c0_4 = arith.constant 0 : index
    %3 = vector.load %arg3[%c0_3, %c0_4] : memref<1x128xf32, #tpu.memory_space<vmem>>, vector<1x128xf32>
    %4 = vector.broadcast %3 : vector<1x128xf32> to vector<136x128xf32>
    %5 = arith.addf %2, %4 : vector<136x128xf32>
    %cst_5 = arith.constant 0.000000e+00 : f32
    %6 = vector.broadcast %cst_5 : f32 to vector<136x128xf32>
    %7 = arith.maximumf %5, %6 : vector<136x128xf32>
    %c0_6 = arith.constant 0 : index
    %c0_7 = arith.constant 0 : index
    %8 = vector.load %arg4[%c0_6, %c0_7] : memref<128x16xf32, #tpu.memory_space<vmem>>, vector<128x16xf32>
    %cst_8 = arith.constant dense<0.000000e+00> : vector<136x16xf32>
    %9 = tpu.matmul %7, %8, %cst_8 {dimension_numbers = #tpu.dot_dimension_numbers<[1], [0], [0], [1], [0, 0, 1, 1], [], []>, precision = #tpu.contract_precision<fp32>} : vector<136x128xf32>, vector<128x16xf32>, vector<136x16xf32> -> vector<136x16xf32>
    %c0_9 = arith.constant 0 : index
    %c0_10 = arith.constant 0 : index
    %10 = memref.load %arg5[%c0_9, %c0_10] : memref<1x1xf32, #tpu.memory_space<smem>>
    %11 = vector.broadcast %10 : f32 to vector<136x16xf32>
    %12 = arith.addf %9, %11 : vector<136x16xf32>
    %c0_11 = arith.constant 0 : index
    %c0_12 = arith.constant 0 : index
    %13 = vector.load %arg6[%c0_11, %c0_12] : memref<136x16xf32, #tpu.memory_space<vmem>>, vector<136x16xf32>
    tpu.vector_store %arg6[%c0_11, %c0_12], %12 {strides = array<i32>} : memref<136x16xf32, #tpu.memory_space<vmem>>, vector<136x16xf32>,
    return
  }
  func.func @transform_0(%arg0: i32) -> (i32, i32) {
    %c0_i32 = arith.constant 0 : i32
    %c0_i32_0 = arith.constant 0 : i32
    return %arg0, %c0_i32 : i32, i32
  }
  func.func @transform_1(%arg0: i32) -> (i32, i32) {
    %c0_i32 = arith.constant 0 : i32
    %c0_i32_0 = arith.constant 0 : i32
    %c0_i32_1 = arith.constant 0 : i32
    return %c0_i32, %c0_i32_0 : i32, i32
  }
  func.func @transform_2(%arg0: i32) -> (i32, i32) {
    %c0_i32 = arith.constant 0 : i32
    %c0_i32_0 = arith.constant 0 : i32
    %c0_i32_1 = arith.constant 0 : i32
    return %c0_i32, %c0_i32_0 : i32, i32
  }
  func.func @transform_3(%arg0: i32) -> (i32, i32) {
    %c0_i32 = arith.constant 0 : i32
    %c0_i32_0 = arith.constant 0 : i32
    %c0_i32_1 = arith.constant 0 : i32
    return %c0_i32, %c0_i32_0 : i32, i32
  }
  func.func @transform_4(%arg0: i32) -> (i32, i32) {
    %c0_i32 = arith.constant 0 : i32
    %c0_i32_0 = arith.constant 0 : i32
    %c0_i32_1 = arith.constant 0 : i32
    return %c0_i32, %c0_i32_0 : i32, i32
  }
  func.func @transform_5(%arg0: i32) -> (i32, i32) {
    %c0_i32 = arith.constant 0 : i32
    %c0_i32_0 = arith.constant 0 : i32
    return %arg0, %c0_i32 : i32, i32
  }
}

</mosaic_0001>

<bundles_post_ra>
// kernel: tpu_custom_call.1
= control target key start
LH: loop header
LB: loop body
LE: loop exit
PB: predicated region body
PF: predicated region fallthrough
CT: control target
= control target key end

     0   :  { %s7549_s0 = inlined_call_operand.hbm [shape: f32[264,128], index: 0, kind: input, shape index: {}]   ;;  %s7550_s1 = inlined_call_operand.vmem [shape: f32[128,128], index: 1, kind: input, shape index: {}]   ;;  %s7551_s2 = inlined_call_operand.vmem [shape: f32[1,128], index: 2, kind: input, shape index: {}]   ;;  %s7552_s3 = inlined_call_operand.vmem [shape: f32[128,16], index: 3, kind: input, shape index: {}]   ;;  %s7553_s4 = inlined_call_operand.<no memory space> [shape: f32[1,1], index: 4, kind: input, shape index: {}]   ;;  %s7554_s5 = inlined_call_operand.vmem [shape: f32[264,16], index: 5, kind: output, shape index: {}]  }
   0x1   :  { %10 = sst [smem:[#allocation2]] %s7553_s4 }
   0x2   :  { %11 = vsyncpa [#allocation4], 0 }
   0x3   :  { %13 = vsyncpa [#allocation4 + $0x1], 0  ;;  %s5653_s20 = smov 0   ;;  %s5655_s21 = smov 0  }
   0x4   :  { %s5657_s22 = smov 0   ;;  %s5659_s23 = smov 0  }
   0x5 LB: > { %s5672_s4 = sadd.s32 4294967295, %s5580_s23   ;;  %s5675_s24 = sadd.s32 1, %s5580_s23   ;;  %s5580_s23 = sphi %s5659_s23, %s7787_s23   ;;  %s5576_s22 = sphi %s5657_s22, %s7786_s22   ;;  %s5572_s21 = sphi %s5655_s21, %s7785_s21   ;;  %s5568_s20 = sphi %s5653_s20, %s7784_s20  }
   0x6   : > { %s23_s25 = ssub.s32 %s5580_s23, %s5675_s24  ;;  %s26_s26 = sadd.s32 1, %s5576_s22 }
   0x7   : > { %p24_p0 = scmp.eq.s32.totalorder %s23_s25, 0  ;;  %p33_p1 = scmp.ne.s32.totalorder %s5576_s22, %s5572_s21 }
   0x8   : > { %p34_p2 = scmp.eq.s32.totalorder %s5580_s23, 0  ;;  %p39_p3 = scmp.ne.s32.totalorder %s5572_s21, %s5568_s20 }
   0x9   : > { %s5685_s27 = scalar_select %p24_p0, %s5576_s22, %s26_s26  }
   0xa   : > { %p35_p4 = por %p34_p2, %p33_p1  ;;  %p40_p5 = scmp.eq.s32.totalorder %s5672_s4, 0 }
   0xb   : > { %p147_p6 = scmp.eq.s32.totalorder %s5672_s4, 1  ;;  %p3301_p9 = scmp.ge.s32.totalorder %s5580_s23, 2 }
   0xc   : > { %p5689_p7 = por %p40_p5, %p39_p3 }
   0xd   : > { %p5693_p8 = por %p147_p6, %p33_p1  ;;  %181 = sbr.rel (%p3301_p9) target bundleno = 55 (0x37), region = 32 }
  0x14   : > { %184 = sbr.rel (!%p35_p4) target bundleno = 55 (0x37), region = 36  ;;  %s185_s30 = sand.u32 (%p35_p4), 1, %s5576_s22  }
  0x15   : > { %s190_s6 = smul.u32 (%p35_p4), 17, %s5580_s23  ;;  %s5703_s11 = scalar_lea.sflag (%p35_p4), [#allocation4], %s185_s30 }
  0x16   : > { %s5377_s7 = smul.u32 (%p35_p4), 136, %s185_s30 }
  0x17   : > { %s191_s8 = ssub.s32 (%p35_p4), 33, %s190_s6 }
  0x18   : > { %p192_p10 = scmp.lt.s32.totalorder (%p35_p4), %s191_s8, 17  ;;  %s189_s12 = scalar_lea.vmem (%p35_p4), [#allocation3], %s5377_s7 }
  0x1b   : > { %s7789_s8 = smov (!%p192_p10, %s191_s8), 17 }
  0x1c   : > { %s5700_s9 = sshll.u32 %s7789_s8, 7 }
  0x1d   : > { %s196_s10 = ssub.s32 2176, %s5700_s9 }
  0x1e   : > { %197 = vsyncadd %s5703_s11, %s196_s10  ;;  %p3303_p11 = scmp.ne.s32.totalorder %s5700_s9, 0  ;;  %s3321_s13 = smul.u32 2176, %s5580_s23 }
  0x1f   : > { %s202_s14 = sshll.u32 %s189_s12, 4  ;;  %s5490_s25 = scalar_lea.hbm %s7549_s0, 4224  ;;  %s5713_s14 = int_to_ptr.vmem [resolvable:$true] %s202_s14 }
  0x20   : > { %s5711_s17 = scalar_lea.hbm %s7549_s0, %s3321_s13 }
  0x21   : > { %s5486_s18 = scalar_lea.hbm %s5711_s17, %s5700_s9  ;;  %p5491_p1 = scmp.lt.u32.totalorder %s5711_s17, %s7549_s0 }
  0x22   : > { %p5487_p12 = scmp.ne.s32.totalorder %s5711_s17, %s5486_s18  ;;  %p5492_p2 = scmp.lt.u32.totalorder %s5490_s25, %s5486_s18 }
  0x23   : > { %p5494_p4 = scmp.lt.u32.totalorder %s5486_s18, %s5711_s17 }
  0x24   : > { %p5488_p13 = pnand %p5487_p12, %p3303_p11  ;;  %p5493_p3 = por %p5492_p2, %p5491_p1 }
  0x26   : > { %p5489_p0 = pneg %p5488_p13  ;;  %p5495_p5 = por %p5494_p4, %p5493_p3 }
  0x28   : > { %p5496_p6 = pnand %p5495_p5, %p5489_p0 }
  0x2a   : > { %5499 = shalt.err (!%p5496_p6)
}
  0x2b   : > { %s5500_s6 = scalar_lea.vmem %s5713_s14, %s5700_s9  ;;  %s5614_s7 = smov [#allocation3]  }
  0x2c   : > { %p5501_p9 = scmp.ne.s32.totalorder %s5713_s14, %s5500_s6  ;;  %s5504_s8 = sshll.u32 %s5614_s7, 4  ;;  %s5505_s8 = int_to_ptr.vmem [resolvable:$false] %s5504_s8 }
  0x2d   : > { %s5506_s10 = scalar_lea.vmem %s5505_s8, 4352  ;;  %p5507_p13 = scmp.lt.s32.totalorder %s5713_s14, %s5505_s8 }
  0x2e   : > { %p5502_p10 = pnand %p5501_p9, %p3303_p11  ;;  %p5508_p1 = scmp.lt.s32.totalorder %s5506_s10, %s5500_s6 }
  0x30   : > { %p5503_p12 = pneg %p5502_p10  ;;  %p5509_p2 = por %p5508_p1, %p5507_p13 }
  0x32   : > { %p5510_p3 = pnand %p5509_p2, %p5503_p12 }
  0x34   : > { %5513 = shalt.err (!%p5510_p3)
}
  0x35   : > { %s5615_s12 = smov 128   ;;  %s5616_s13 = smov 8  }
  0x36   : > { %208 = dma.hbm_to_vmem [thread:$0]  (%p3303_p11), %s5711_s17, %s5700_s9, %s5713_s14, %s5703_s11, %s5615_s12, %s5615_s12, %s5616_s13  }
  0x37 PF: > { %p3307_p0 = scmp.ge.s32.totalorder %s5580_s23, 1  ;;  %p210_p4 = scmp.lt.s32.totalorder %s5580_s23, 3 }
  0x39   : > { %p211_p5 = pnand %p3307_p0, %p210_p4 }
  0x3b   : > { %214 = sbr.rel (%p211_p5) target bundleno = 1353 (0x549), region = 40 }
  0x42   : > { %s216_s15 = sand.u32 1, %s5572_s21  }
  0x43   : > { %s5743_s16 = smul.u32 136, %s216_s15  ;;  %s217_s18 = scalar_lea.sflag [#allocation4], %s216_s15 }
  0x45   : > { %s5746_s19 = scalar_lea.vmem [#allocation3], %s5743_s16 }
  0x46   : > { %5563 = dma.done.wait (%p5689_p7), %s217_s18, 2176  }
  0x47   : > { %5565 = vsyncadd (%p5689_p7), %s217_s18, 4294965120  ;;  %v7584_v0 = vmov 0.0|0.0   ;;  %vm5618_vm0 = vmmov 0   ;;  %v7579_v1 = vmov 0.0   ;;  %v273_v2 = vld [vmem:[%s7550_s1] sm:$0xff]  ;;  %v274_v3 = vld [vmem:[%s7550_s1 + $0x8] sm:$0xff] }
  0x48   : > { %4715 = vmatprep.subr.bf16.mxu0 %v7584_v0  ;;  %3751 = vmatprep.mubr.msk.f32.mxu0 %vm5618_vm0, %v7579_v1  ;;  %v275_v4 = vld [vmem:[%s7550_s1 + $0x10] sm:$0xff]  ;;  %v297_v5 = vand.u32 4294901760, %v273_v2  ;;  %v300_v6 = vand.u32 4294901760, %v274_v3  ;;  %v276_v7 = vld [vmem:[%s7550_s1 + $0x18] sm:$0xff]  ;;  %v277_v10 = vld [vmem:[%s7550_s1 + $0x20] sm:$0xff]  ;;  %s1658_s6 = sld [smem:[#allocation2]] }
  0x49   : > { %4859 = vmatprep.subr.bf16.mxu1 %v7584_v0  ;;  %4249 = vmatprep.mubr.msk.f32.mxu1 %vm5618_vm0, %v7579_v1  ;;  %v303_v8 = vand.u32 4294901760, %v275_v4  ;;  %v306_v9 = vand.u32 4294901760, %v276_v7  ;;  %v278_v11 = vld [vmem:[%s7550_s1 + $0x28] sm:$0xff]  ;;  %v309_v14 = vand.u32 4294901760, %v277_v10  ;;  %v279_v16 = vld [vmem:[%s7550_s1 + $0x30] sm:$0xff]  ;;  %v280_v17 = vld [vmem:[%s7550_s1 + $0x38] sm:$0xff] }
  0x4a   : > { %v5776_v12 = vpack.c.bf16 %v300_v6, %v297_v5  ;;  %v312_v15 = vand.u32 4294901760, %v278_v11  ;;  %v315_v19 = vand.u32 4294901760, %v279_v16  ;;  %v318_v20 = vand.u32 4294901760, %v280_v17  ;;  %v5795_v21 = vld [vmem:[%s7550_s1 + $0x40] sm:$0xff]  ;;  %v5800_v22 = vld [vmem:[%s7550_s1 + $0x48] sm:$0xff]  ;;  %v5812_v27 = vld [vmem:[%s7550_s1 + $0x50] sm:$0xff] }
  0x4b   : > { %v5779_v13 = vpack.c.bf16 %v306_v9, %v303_v8  ;;  %v321_v24 = vand.u32 4294901760, %v5795_v21  ;;  %v324_v25 = vand.u32 4294901760, %v5800_v22  ;;  %v256_v26 = vld [vmem:[%s5746_s19] sm:$0xff]  ;;  %v5817_v28 = vld [vmem:[%s7550_s1 + $0x58] sm:$0xff]  ;;  %v5819_v29 = vsub.f32 %v273_v2, %v297_v5  ;;  %v257_v35 = vld [vmem:[%s5746_s19 + $0x8] sm:$0xff]  ;;  %s7397_s7 = scalar_lea.vmem [#allocation5], %s5743_s16  }
  0x4c   : > { %4717 = vmatpush3.bf16.msra.mxu0 %v5776_v12  ;;  %v5789_v18 = vpack.c.bf16 %v312_v15, %v309_v14  ;;  %v5803_v23 = vpack.c.bf16 %v318_v20, %v315_v19  ;;  %v5821_v30 = vsub.f32 %v274_v3, %v300_v6  ;;  %v5823_v31 = vand.u32 4294901760, %v256_v26  ;;  %v5839_v36 = vld [vmem:[%s7550_s1 + $0x60] sm:$0xff]  ;;  %v5844_v37 = vld [vmem:[%s7550_s1 + $0x68] sm:$0xff]  ;;  %v5852_v40 = vld [vmem:[%s7550_s1 + $0x70] sm:$0xff]  ;;  %s3014_s16 = smul.u32 (%p5693_p8), 17, %s5672_s4 }
  0x4d   : > { %4718 = vmatprep.subr.bf16.mxu0 %v7584_v0  ;;  %v5830_v32 = vpack.c.bf16 %v324_v25, %v321_v24  ;;  %v327_v33 = vand.u32 4294901760, %v5812_v27  ;;  %v330_v34 = vand.u32 4294901760, %v5817_v28  ;;  %v7564_v38 = vand.u32 4294901760, %v5819_v29  ;;  %v5857_v41 = vld [vmem:[%s7550_s1 + $0x78] sm:$0xff]  ;;  %v260_v55 = vld [vmem:[%s5746_s19 + $0x20] sm:$0xff]  ;;  %s3322_s8 = smul.u32 (%p5693_p8), 136, %s5672_s4 }
  0x4e   : > { %v5847_v39 = vsub.f32 %v275_v4, %v303_v8  ;;  %v5860_v42 = vsub.f32 %v256_v26, %v5823_v31  ;;  %v7561_v43 = vand.u32 4294901760, %v5821_v30  ;;  %v5863_v44 = vand.u32 4294901760, %v257_v35  ;;  %v258_v49 = vld [vmem:[%s5746_s19 + $0x10] sm:$0xff]  ;;  %v259_v54 = vld [vmem:[%s5746_s19 + $0x18] sm:$0xff]  ;;  %s3015_s10 = ssub.s32 (%p5693_p8), 33, %s3014_s16 }
  0x4f   : > { %v5865_v45 = vsub.f32 %v276_v7, %v306_v9  ;;  %v5872_v46 = vpack.c.bf16 %v330_v34, %v327_v33  ;;  %v333_v47 = vand.u32 4294901760, %v5839_v36  ;;  %v336_v48 = vand.u32 4294901760, %v5844_v37  ;;  %p3016_p7 = scmp.lt.s32.totalorder (%p5693_p8), %s3015_s10, 17  ;;  %s7456_s13 = scalar_lea.vmem (%p5693_p8), %s7554_s5, %s3322_s8  }
  0x50   : > { %4720 = vmatpush3.bf16.msra.mxu0 %v5779_v13  ;;  %v5878_v50 = vsub.f32 %v277_v10, %v309_v14  ;;  %v339_v51 = vand.u32 4294901760, %v5852_v40  ;;  %v342_v52 = vand.u32 4294901760, %v5857_v41  ;;  %v551_v53 = vsub.f32 %v5819_v29, %v7564_v38 }
  0x51   : > { %4721 = vmatprep.subr.bf16.mxu0 %v7584_v0  ;;  %v7560_v56 = vand.u32 4294901760, %v5860_v42  ;;  %v558_v57 = vsub.f32 %v5821_v30, %v7561_v43  ;;  %v5892_v58 = vsub.f32 %v257_v35, %v5863_v44  ;;  %v5894_v59 = vand.u32 4294901760, %v258_v49 }
  0x52   : > { %v5896_v60 = vsub.f32 %v278_v11, %v312_v15  ;;  %v5903_v61 = vpack.c.bf16 %v336_v48, %v333_v47  ;;  %v7556_v62 = vand.u32 4294901760, %v5847_v39  ;;  %v7555_v63 = vand.u32 4294901760, %v5865_v45 }
  0x53   : > { %v5908_v2 = vand.u32 4294901760, %v259_v54  ;;  %v5910_v3 = vand.u32 4294901760, %v260_v55  ;;  %v5912_v4 = vsub.f32 %v279_v16, %v315_v19  ;;  %v5914_v5 = vsub.f32 %v280_v17, %v318_v20 }
  0x54   : > { %4723 = vmatpush3.bf16.msra.mxu0 %v5789_v18  ;;  %v5920_v6 = vpack.c.bf16 %v342_v52, %v339_v51  ;;  %v552_v7 = vand.u32 4294901760, %v551_v53  ;;  %v380_v8 = vsub.f32 %v5860_v42, %v7560_v56  ;;  %v559_v9 = vand.u32 4294901760, %v558_v57 }
  0x55   : > { %4724 = vmatprep.subr.bf16.mxu0 %v7584_v0  ;;  %v7559_v10 = vand.u32 4294901760, %v5892_v58  ;;  %v5927_v11 = vsub.f32 %v258_v49, %v5894_v59  ;;  %v565_v14 = vsub.f32 %v5847_v39, %v7556_v62  ;;  %v572_v15 = vsub.f32 %v5865_v45, %v7555_v63 }
  0x56   : > { %v7557_v16 = vand.u32 4294901760, %v5878_v50  ;;  %v7558_v17 = vand.u32 4294901760, %v5896_v60  ;;  %v5940_v19 = vsub.f32 %v259_v54, %v5908_v2  ;;  %v5943_v20 = vsub.f32 %v260_v55, %v5910_v3 }
  0x57   : > { %v5948_v26 = vsub.f32 %v5795_v21, %v321_v24  ;;  %v5953_v35 = vsub.f32 %v5800_v22, %v324_v25  ;;  %v7563_v49 = vand.u32 4294901760, %v5912_v4  ;;  %v7562_v53 = vand.u32 4294901760, %v5914_v5  ;;  %v261_v21 = vld [vmem:[%s5746_s19 + $0x28] sm:$0xff] }
  0x58   : > { %4726 = vmatpush3.bf16.msra.mxu0 %v5803_v23  ;;  %v381_v54 = vand.u32 4294901760, %v380_v8  ;;  %v4740_v57 = vpack.c.bf16 %v559_v9, %v552_v7  ;;  %v390_v55 = vsub.f32 %v5892_v58, %v7559_v10  ;;  %v7571_v63 = vand.u32 4294901760, %v5927_v11 }
  0x59   : > { %4727 = vmatprep.subr.bf16.mxu0 %v7584_v0  ;;  %v566_v24 = vand.u32 4294901760, %v565_v14  ;;  %v573_v62 = vand.u32 4294901760, %v572_v15  ;;  %v579_v22 = vsub.f32 %v5878_v50, %v7557_v16  ;;  %v586_v25 = vsub.f32 %v5896_v60, %v7558_v17  ;;  %v262_v15 = vld [vmem:[%s5746_s19 + $0x30] sm:$0xff] }
  0x5a   : > { %v5972_v7 = vsub.f32 %v5812_v27, %v327_v33  ;;  %v7566_v8 = vand.u32 4294901760, %v5940_v19  ;;  %v7565_v9 = vand.u32 4294901760, %v5943_v20  ;;  %v5977_v14 = vand.u32 4294901760, %v261_v21 }
  0x5b   : > { %v593_v16 = vsub.f32 %v5912_v4, %v7563_v49  ;;  %v600_v17 = vsub.f32 %v5914_v5, %v7562_v53  ;;  %v7568_v27 = vand.u32 4294901760, %v5948_v26  ;;  %v5990_v33 = vsub.f32 %v5817_v28, %v330_v34 }
  0x5c   : > { %4729 = vmatpush3.bf16.msra.mxu0 %v5830_v32  ;;  %v391_v10 = vand.u32 4294901760, %v390_v55  ;;  %v400_v56 = vsub.f32 %v5927_v11, %v7571_v63  ;;  %v7567_v43 = vand.u32 4294901760, %v5953_v35  ;;  %v4743_v53 = vpack.c.bf16 %v573_v62, %v566_v24  ;;  %v266_v63 = vld [vmem:[%s5746_s19 + $0x50] sm:$0xff] }
  0x5d   : > { %4730 = vmatprep.subr.bf16.mxu0 %v7584_v0  ;;  %v580_v49 = vand.u32 4294901760, %v579_v22  ;;  %v587_v38 = vand.u32 4294901760, %v586_v25  ;;  %v6001_v28 = vsub.f32 %v5839_v36, %v333_v47  ;;  %v410_v34 = vsub.f32 %v5940_v19, %v7566_v8  ;;  %v263_v22 = vld [vmem:[%s5746_s19 + $0x38] sm:$0xff] }
  0x5e   : > { %v6013_v62 = vsub.f32 %v261_v21, %v5977_v14  ;;  %v594_v55 = vand.u32 4294901760, %v593_v16  ;;  %v601_v24 = vand.u32 4294901760, %v600_v17  ;;  %v607_v36 = vsub.f32 %v5948_v26, %v7568_v27  ;;  %v264_v27 = vld [vmem:[%s5746_s19 + $0x40] sm:$0xff] }
  0x5f   : > { %v401_v47 = vand.u32 4294901760, %v400_v56  ;;  %v614_v25 = vsub.f32 %v5953_v35, %v7567_v43  ;;  %v7569_v8 = vand.u32 4294901760, %v5990_v33  ;;  %v6027_v16 = vsub.f32 %v5844_v37, %v336_v48 }
  0x60   : > { %4732 = vmatpush3.bf16.msra.mxu0 %v5872_v46  ;;  %v4746_v56 = vpack.c.bf16 %v587_v38, %v580_v49  ;;  %v6039_v17 = vsub.f32 %v5857_v41, %v342_v52  ;;  %v411_v21 = vand.u32 4294901760, %v410_v34  ;;  %v4749_v48 = vpack.c.bf16 %v601_v24, %v594_v55 }
  0x61   : > { %4733 = vmatprep.subr.bf16.mxu0 %v7584_v0  ;;  %v615_v38 = vand.u32 4294901760, %v614_v25  ;;  %v628_v52 = vsub.f32 %v5990_v33, %v7569_v8  ;;  %v7574_v34 = vand.u32 4294901760, %v6027_v16  ;;  %vm2989_vm1 = vcmask 130048  }
  0x64   : > { %4735 = vmatpush3.bf16.msra.mxu0 %v5903_v61 }
  0x65   : > { %4736 = vmatprep.subr.bf16.mxu0 %v7584_v0 }
  0x68   : > { %4738 = vmatpush3.bf16.msra.mxu0 %v5920_v6 }
  0x69   : > { %4739 = vmatprep.subr.bf16.mxu0 %v7584_v0 }
  0x6b   : > { %3752 = vmatmul.mubr.f32.vlgmr.msra.gmra.mrb[0].mxu0 %v381_v54  ;;  %v420_v54 = vsub.f32 %v5943_v20, %v7565_v9  ;;  %v7570_v9 = vand.u32 4294901760, %v5972_v7 }
  0x6c   : > { %4741 = vmatpush3.bf16.msra.mxu0 %v4740_v57  ;;  %3754 = vmatprep.mubr.msk.f32.mxu0 %vm5618_vm0, %v7579_v1  ;;  %v6010_v57 = vand.u32 4294901760, %v262_v15 }
  0x6d   : > { %4742 = vmatprep.subr.bf16.mxu0 %v7584_v0  ;;  %v421_v43 = vand.u32 4294901760, %v420_v54  ;;  %v621_v41 = vsub.f32 %v5972_v7, %v7570_v9 }
  0x6e   : > { %v6043_v37 = vsub.f32 %v262_v15, %v6010_v57  ;;  %v7573_v15 = vand.u32 4294901760, %v6001_v28 }
  0x6f   : > { %3755 = vmatmul.mubr.f32.gmra.mrb[2].mxu0 %v391_v10  ;;  %v6032_v10 = vsub.f32 %v5852_v40, %v339_v51  ;;  %v7572_v40 = vand.u32 4294901760, %v6013_v62  ;;  %v6046_v51 = vand.u32 4294901760, %v263_v22  ;;  %v622_v54 = vand.u32 4294901760, %v621_v41 }
  0x70   : > { %3757 = vmatprep.mubr.msk.f32.mxu0 %vm5618_vm0, %v7579_v1  ;;  %4744 = vmatpush3.bf16.msra.mxu0 %v4743_v53  ;;  %v608_v53 = vand.u32 4294901760, %v607_v36  ;;  %v7577_v24 = vand.u32 4294901760, %v6043_v37  ;;  %v6067_v36 = vand.u32 4294901760, %v264_v27 }
  0x71   : > { %4745 = vmatprep.subr.bf16.mxu0 %v7584_v0  ;;  %v6077_v8 = vsub.f32 %v263_v22, %v6046_v51  ;;  %v265_v22 = vld [vmem:[%s5746_s19 + $0x48] sm:$0xff] }
  0x72   : > { %v4752_v55 = vpack.c.bf16 %v615_v38, %v608_v53  ;;  %v7576_v53 = vand.u32 4294901760, %v6032_v10  ;;  %v7575_v38 = vand.u32 4294901760, %v6039_v17  ;;  %v6101_v41 = vsub.f32 %v264_v27, %v6067_v36 }
  0x73   : > { %3758 = vmatmul.mubr.f32.gmra.mrb[4].mxu0 %v401_v47  ;;  %v629_v47 = vand.u32 4294901760, %v628_v52  ;;  %v6104_v25 = vand.u32 4294901760, %v265_v22 }
  0x74   : > { %3760 = vmatprep.mubr.msk.f32.mxu0 %vm5618_vm0, %v7579_v1  ;;  %4747 = vmatpush3.bf16.msra.mxu0 %v4746_v56  ;;  %v430_v56 = vsub.f32 %v6013_v62, %v7572_v40  ;;  %v635_v40 = vsub.f32 %v6001_v28, %v7573_v15  ;;  %v7578_v15 = vand.u32 4294901760, %v6077_v8  ;;  %v649_v27 = vsub.f32 %v6032_v10, %v7576_v53 }
  0x75   : > { %4748 = vmatprep.subr.bf16.mxu0 %v7584_v0 }
  0x76   : > { %v431_v52 = vand.u32 4294901760, %v430_v56  ;;  %v636_v9 = vand.u32 4294901760, %v635_v40  ;;  %v6121_v40 = vsub.f32 %v265_v22, %v6104_v25  ;;  %v6123_v56 = vand.u32 4294901760, %v266_v63 }
  0x77   : > { %3761 = vmatmul.mubr.f32.gmra.mrb[6].mxu0 %v411_v21  ;;  %v642_v21 = vsub.f32 %v6027_v16, %v7574_v34  ;;  %v4755_v34 = vpack.c.bf16 %v629_v47, %v622_v54  ;;  %v7581_v54 = vand.u32 4294901760, %v6101_v41  ;;  %v650_v53 = vand.u32 4294901760, %v649_v27 }
  0x78   : > { %3763 = vmatprep.mubr.msk.f32.mxu0 %vm5618_vm0, %v7579_v1  ;;  %4750 = vmatpush3.bf16.msra.mxu0 %v4749_v48  ;;  %v440_v48 = vsub.f32 %v6043_v37, %v7577_v24  ;;  %7663 = vst [vmem:[#allocation7_spill] sm:$0xff] %v6121_v40 }
  0x79   : > { %4751 = vmatprep.subr.bf16.mxu0 %v7584_v0  ;;  %v643_v49 = vand.u32 4294901760, %v642_v21  ;;  %v267_v21 = vld [vmem:[%s5746_s19 + $0x58] sm:$0xff] }
  0x7a   : > { %v441_v47 = vand.u32 4294901760, %v440_v48  ;;  %v460_v48 = vsub.f32 %v6101_v41, %v7581_v54  ;;  %v269_v54 = vld [vmem:[%s5746_s19 + $0x68] sm:$0xff] }
  0x7b   : > { %3764 = vmatmul.mubr.f32.gmra.mrb[8].mxu0 %v421_v43  ;;  %v656_v43 = vsub.f32 %v6039_v17, %v7575_v38  ;;  %v4758_v38 = vpack.c.bf16 %v643_v49, %v636_v9  ;;  %v268_v9 = vld [vmem:[%s5746_s19 + $0x60] sm:$0xff] }
  0x7c   : > { %3766 = vmatprep.mubr.msk.f32.mxu0 %vm5618_vm0, %v7579_v1  ;;  %4753 = vmatpush3.bf16.msra.mxu0 %v4752_v55  ;;  %v450_v55 = vsub.f32 %v6077_v8, %v7578_v15  ;;  %v6134_v15 = vsub.f32 %v266_v63, %v6123_v56  ;;  %v461_v27 = vand.u32 4294901760, %v460_v48 }
  0x7d   : > { %4754 = vmatprep.subr.bf16.mxu0 %v7584_v0  ;;  %v657_v24 = vand.u32 4294901760, %v656_v43 }
  0x7e   : > { %v451_v22 = vand.u32 4294901760, %v450_v55  ;;  %7664 = vst [vmem:[#allocation8_spill] sm:$0xff] %v6134_v15  ;;  %v7582_v63 = vand.u32 4294901760, %v6134_v15  ;;  %v6149_v55 = vand.u32 4294901760, %v268_v9 }
  0x7f   : > { %3767 = vmatmul.mubr.f32.gmra.mrb[10].mxu0 %v431_v52  ;;  %v7583_v52 = vand.u32 4294901760, %v6121_v40  ;;  %v4761_v49 = vpack.c.bf16 %v657_v24, %v650_v53  ;;  %v6155_v24 = vand.u32 4294901760, %v269_v54 }
  0x80   : > { %3769 = vmatprep.mubr.msk.f32.mxu0 %vm5618_vm0, %v7579_v1  ;;  %4756 = vmatpush3.bf16.msra.mxu0 %v4755_v34  ;;  %v6136_v1 = vand.u32 4294901760, %v267_v21  ;;  %v7665_v34 = vmov 0.0   ;;  %v6162_v48 = vsub.f32 %v268_v9, %v6149_v55  ;;  %v271_v9 = vld [vmem:[%s5746_s19 + $0x78] sm:$0xff] }
  0x81   : > { %4757 = vmatprep.subr.bf16.mxu0 %v7584_v0  ;;  %v470_v43 = vsub.f32 %v6121_v40, %v7583_v52  ;;  %7667 = vst [vmem:[#allocation10_spill] sm:$0xff] %v6155_v24 }
  0x82   : > { %7668 = vst [vmem:[#allocation11_spill] sm:$0xff] %v6162_v48 }
  0x83   : > { %3770 = vmatmul.mubr.f32.gmra.mrb[12].mxu0 %v441_v47  ;;  %v6147_v47 = vsub.f32 %v267_v21, %v6136_v1  ;;  %v471_v53 = vand.u32 4294901760, %v470_v43 }
  0x84   : > { %3772 = vmatprep.mubr.msk.f32.mxu0 %vm5618_vm0, %v7665_v34  ;;  %4759 = vmatpush3.bf16.msra.mxu0 %v4758_v38  ;;  %v480_v38 = vsub.f32 %v6134_v15, %v7582_v63  ;;  %v7593_v63 = vand.u32 4294901760, %v6162_v48 }
  0x85   : > { %4760 = vmatprep.subr.bf16.mxu0 %v7584_v0  ;;  %7666 = vst [vmem:[#allocation9_spill] sm:$0xff] %v6147_v47  ;;  %v7588_v21 = vand.u32 4294901760, %v6147_v47 }
  0x87   : > { %3773 = vmatmul.mubr.f32.gmra.mrb[14].mxu0 %v451_v22  ;;  %v270_v22 = vld [vmem:[%s5746_s19 + $0x70] sm:$0xff]  ;;  %v490_v43 = vsub.f32 %v6147_v47, %v7588_v21  ;;  %v272_v21 = vld [vmem:[%s5746_s19 + $0x80] sm:$0xff] }
  0x88   : > { %3775 = vmatprep.mubr.msk.f32.mxu0 %vm5618_vm0, %v7665_v34  ;;  %4762 = vmatpush3.bf16.msra.mxu0 %v4761_v49  ;;  %v6168_v49 = vsub.f32 %v269_v54, %v6155_v24  ;;  %v6174_v52 = vand.u32 4294901760, %v270_v22  ;;  %v500_v54 = vsub.f32 %v6162_v48, %v7593_v63  ;;  %v6198_v63 = vand.u32 4294901760, %v272_v21 }
  0x89   : > { %4763 = vmatprep.subr.bf16.mxu0 %v7584_v0  ;;  %v491_v15 = vand.u32 4294901760, %v490_v43 }
  0x8a   : > { %7669 = vst [vmem:[#allocation12_spill] sm:$0xff] %v6174_v52  ;;  %v7596_v0 = vand.u32 4294901760, %v6168_v49  ;;  %7671 = vst [vmem:[#allocation14_spill] sm:$0xff] %v6198_v63 }
  0x8b   : > { %3776 = vmatmul.mubr.f32.gmra.mrb[16].mxu0 %v461_v27  ;;  %v481_v27 = vand.u32 4294901760, %v480_v38  ;;  %v6186_v38 = vand.u32 4294901760, %v271_v9 }
  0x8c   : > { %3778 = vmatprep.mubr.msk.f32.mxu0 %vm5618_vm0, %v7665_v34  ;;  %v510_v47 = vsub.f32 %v6168_v49, %v7596_v0 }
  0x8d   : > { %7670 = vst [vmem:[#allocation13_spill] sm:$0xff] %v6186_v38  ;;  %v6196_v40 = vsub.f32 %v271_v9, %v6186_v38 }
  0x8f   : > { %3779 = vmatmul.mubr.f32.gmra.mrb[18].mxu0 %v471_v53  ;;  %v6184_v53 = vsub.f32 %v270_v22, %v6174_v52  ;;  %v511_v22 = vand.u32 4294901760, %v510_v47  ;;  %v7598_v0 = vand.u32 4294901760, %v6196_v40 }
  0x90   : > { %3781 = vmatprep.mubr.msk.f32.mxu0 %vm5618_vm0, %v7665_v34 }
  0x91   : > { %v7599_v43 = vand.u32 4294901760, %v6184_v53 }
  0x93   : > { %3782 = vmatmul.mubr.f32.gmra.mrb[20].mxu0 %v481_v27  ;;  %v501_v27 = vand.u32 4294901760, %v500_v54  ;;  %v520_v48 = vsub.f32 %v6184_v53, %v7599_v43  ;;  %v530_v54 = vsub.f32 %v6196_v40, %v7598_v0  ;;  %v7687_v43 = vand.u32 4294901760, %v5860_v42 }
  0x94   : > { %3784 = vmatprep.mubr.msk.f32.mxu0 %vm5618_vm0, %v7665_v34 }
  0x95   : > { %v521_v9 = vand.u32 4294901760, %v520_v48 }
  0x97   : > { %3785 = vmatmul.mubr.f32.gmra.mrb[22].mxu0 %v491_v15  ;;  %v6207_v15 = vsub.f32 %v272_v21, %v6198_v63 }
  0x98   : > { %3787 = vmatprep.mubr.msk.f32.mxu0 %vm5618_vm0, %v7665_v34 }
  0x99   : > { %v7597_v47 = vand.u32 4294901760, %v6207_v15 }
  0x9b   : > { %3788 = vmatmul.mubr.f32.gmra.mrb[24].mxu0 %v501_v27  ;;  %v531_v27 = vand.u32 4294901760, %v530_v54  ;;  %v540_v21 = vsub.f32 %v6207_v15, %v7597_v47  ;;  %v7674_v54 = vpack.c.bf16 %v5865_v45, %v5847_v39  ;;  %v7686_v47 = vand.u32 4294901760, %v5821_v30 }
  0x9c   : > { %3790 = vmatprep.mubr.msk.f32.mxu0 %vm5618_vm0, %v7665_v34 }
  0x9d   : > { %v541_v48 = vand.u32 4294901760, %v540_v21  ;;  %v7676_v21 = vpack.c.bf16 %v5914_v5, %v5912_v4 }
  0x9f   : > { %3791 = vmatmul.mubr.f32.gmra.mrb[26].mxu0 %v511_v22  ;;  %v7672_v22 = vpack.c.bf16 %v5821_v30, %v5819_v29 }
  0xa0   : > { %3793 = vmatprep.mubr.msk.f32.mxu0 %vm5618_vm0, %v7665_v34 }
  0xa3   : > { %3794 = vmatmul.mubr.f32.gmra.mrb[28].mxu0 %v521_v9  ;;  %v7673_v9 = vmov 0.0|0.0  }
  0xa4   : > { %3796 = vmatprep.mubr.msk.f32.mxu0 %vm5618_vm0, %v7665_v34 }
  0xa7   : > { %3797 = vmatmul.mubr.f32.gmra.mrb[30].mxu0 %v531_v27  ;;  %v7675_v27 = vpack.c.bf16 %v5896_v60, %v5878_v50 }
  0xa8   : > { %3799 = vmatprep.mubr.msk.f32.mxu0 %vm5618_vm0, %v7665_v34 }
  0xab   : > { %3800 = vmatmul.mubr.f32.gmra.mrb[32].mxu0 %v541_v48  ;;  %v7677_v48 = vpack.c.bf16 %v5953_v35, %v5948_v26 }
  0xac   : > { %3834 = vmatprep.mubr.msk.f32.mxu0 %vm5618_vm0, %v7665_v34 }
  0xaf   : > { %3835 = vmatmul.mubr.f32.vlgmr.msra.gmra.mrb[0].mxu0 %v5823_v31 }
  0xb0   : > { %4765 = vmatpush3.bf16.msra.mxu0 %v7672_v22  ;;  %3837 = vmatprep.mubr.msk.f32.mxu0 %vm5618_vm0, %v7665_v34  ;;  %v7678_v22 = vpack.c.bf16 %v5990_v33, %v5972_v7 }
  0xb1   : > { %4766 = vmatprep.subr.bf16.mxu0 %v7673_v9 }
  0xb3   : > { %3838 = vmatmul.mubr.f32.gmra.mrb[2].mxu0 %v5863_v44 }
  0xb4   : > { %3840 = vmatprep.mubr.msk.f32.mxu0 %vm5618_vm0, %v7665_v34  ;;  %4768 = vmatpush3.bf16.msra.mxu0 %v7674_v54  ;;  %v7679_v54 = vpack.c.bf16 %v6027_v16, %v6001_v28 }
  0xb5   : > { %4769 = vmatprep.subr.bf16.mxu0 %v7673_v9 }
  0xb7   : > { %3841 = vmatmul.mubr.f32.gmra.mrb[4].mxu0 %v5894_v59 }
  0xb8   : > { %3843 = vmatprep.mubr.msk.f32.mxu0 %vm5618_vm0, %v7665_v34  ;;  %4771 = vmatpush3.bf16.msra.mxu0 %v7675_v27  ;;  %v7680_v27 = vpack.c.bf16 %v6039_v17, %v6032_v10 }
  0xb9   : > { %4772 = vmatprep.subr.bf16.mxu0 %v7673_v9 }
  0xbb   : > { %3844 = vmatmul.mubr.f32.gmra.mrb[6].mxu0 %v5908_v2 }
  0xbc   : > { %3846 = vmatprep.mubr.msk.f32.mxu0 %vm5618_vm0, %v7665_v34  ;;  %4774 = vmatpush3.bf16.msra.mxu0 %v7676_v21  ;;  %v7681_v21 = vld [vmem:[#allocation7_spill] sm:$0xff] }
  0xbd   : > { %4775 = vmatprep.subr.bf16.mxu0 %v7673_v9 }
  0xbf   : > { %3847 = vmatmul.mubr.f32.gmra.mrb[8].mxu0 %v5910_v3 }
  0xc0   : > { %3849 = vmatprep.mubr.msk.f32.mxu0 %vm5618_vm0, %v7665_v34  ;;  %4777 = vmatpush3.bf16.msra.mxu0 %v7677_v48  ;;  %v7682_v48 = vld [vmem:[#allocation8_spill] sm:$0xff] }
  0xc1   : > { %4778 = vmatprep.subr.bf16.mxu0 %v7673_v9 }
  0xc3   : > { %3850 = vmatmul.mubr.f32.gmra.mrb[10].mxu0 %v5977_v14 }
  0xc4   : > { %3852 = vmatprep.mubr.msk.f32.mxu0 %vm5618_vm0, %v7665_v34  ;;  %4780 = vmatpush3.bf16.msra.mxu0 %v7678_v22  ;;  %v7683_v22 = vld [vmem:[#allocation9_spill] sm:$0xff] }
  0xc5   : > { %4781 = vmatprep.subr.bf16.mxu0 %v7673_v9 }
  0xc7   : > { %3853 = vmatmul.mubr.f32.gmra.mrb[12].mxu0 %v6010_v57 }
  0xc8   : > { %3855 = vmatprep.mubr.msk.f32.mxu0 %vm5618_vm0, %v7665_v34  ;;  %4783 = vmatpush3.bf16.msra.mxu0 %v7679_v54  ;;  %v7684_v54 = vld [vmem:[#allocation11_spill] sm:$0xff] }
  0xc9   : > { %4784 = vmatprep.subr.bf16.mxu0 %v7673_v9 }
  0xcb   : > { %3856 = vmatmul.mubr.f32.gmra.mrb[14].mxu0 %v6046_v51 }
  0xcc   : > { %3858 = vmatprep.mubr.msk.f32.mxu0 %vm5618_vm0, %v7665_v34  ;;  %4786 = vmatpush3.bf16.msra.mxu0 %v7680_v27  ;;  %v7685_v27 = vand.u32 4294901760, %v5819_v29  ;;  %v7691_v29 = vand.u32 4294901760, %v5878_v50  ;;  %v7696_v50 = vand.u32 4294901760, %v5940_v19 }
  0xcd   : > { %4787 = vmatprep.subr.bf16.mxu0 %v7673_v9 }
  0xce   : > { %v4812_v0 = vpack.c.bf16 %v7686_v47, %v7685_v27  ;;  %v7716_v47 = vand.u32 4294901760, %v6196_v40  ;;  %v1647_v27 = vld [vmem:[%s7552_s3 + $0x28] sm:$0xff] }
  0xcf   : > { %3859 = vmatmul.mubr.f32.gmra.mrb[16].mxu0 %v6067_v36 }
  0xd0   : > { %3861 = vmatprep.mubr.msk.f32.mxu0 %vm5618_vm0, %v7665_v34 }
  0xd3   : > { %3862 = vmatmul.mubr.f32.gmra.mrb[18].mxu0 %v6104_v25 }
  0xd4   : > { %3864 = vmatprep.mubr.msk.f32.mxu0 %vm5618_vm0, %v7665_v34 }
  0xd7   : > { %3865 = vmatmul.mubr.f32.gmra.mrb[20].mxu0 %v6123_v56 }
  0xd8   : > { %3867 = vmatprep.mubr.msk.f32.mxu0 %vm5618_vm0, %v7665_v34 }
  0xdb   : > { %3868 = vmatmul.mubr.f32.gmra.mrb[22].mxu0 %v6136_v1 }
  0xdc   : > { %3870 = vmatprep.mubr.msk.f32.mxu0 %vm5618_vm0, %v7665_v34 }
  0xdf   : > { %3871 = vmatmul.mubr.f32.gmra.mrb[24].mxu0 %v6149_v55 }
  0xe0   : > { %3873 = vmatprep.mubr.msk.f32.mxu0 %vm5618_vm0, %v7665_v34 }
  0xe3   : > { %3874 = vmatmul.mubr.f32.gmra.mrb[26].mxu0 %v6155_v24  ;;  %v7690_v24 = vand.u32 4294901760, %v5892_v58 }
  0xe4   : > { %3876 = vmatprep.mubr.msk.f32.mxu0 %vm5618_vm0, %v7665_v34 }
  0xe7   : > { %3877 = vmatmul.mubr.f32.gmra.mrb[28].mxu0 %v6174_v52 }
  0xe8   : > { %3879 = vmatprep.mubr.msk.f32.mxu0 %vm5618_vm0, %v7665_v34 }
  0xeb   : > { %3880 = vmatmul.mubr.f32.gmra.mrb[30].mxu0 %v6186_v38  ;;  %v7689_v38 = vand.u32 4294901760, %v5865_v45  ;;  %v7695_v45 = vand.u32 4294901760, %v5914_v5  ;;  %v7700_v5 = vand.u32 4294901760, %v5972_v7  ;;  %v7705_v7 = vand.u32 4294901760, %v6043_v37 }
  0xec   : > { %3882 = vmatprep.mubr.msk.f32.mxu0 %vm5618_vm0, %v7665_v34 }
  0xef   : > { %3883 = vmatmul.mubr.f32.gmra.mrb[32].mxu0 %v6198_v63  ;;  %v7688_v63 = vand.u32 4294901760, %v5847_v39  ;;  %v7693_v39 = vand.u32 4294901760, %v5927_v11 }
  0xf0   : > { %3917 = vmatprep.mubr.msk.f32.mxu0 %vm5618_vm0, %v7665_v34 }
  0xf1   : > { %v4815_v52 = vpack.c.bf16 %v7689_v38, %v7688_v63 }
  0xf3   : > { %3918 = vmatmul.mubr.f32.vlgmr.msra.gmra.mrb[0].mxu0 %v5860_v42  ;;  %v7694_v42 = vand.u32 4294901760, %v5912_v4  ;;  %v7699_v4 = vand.u32 4294901760, %v5943_v20 }
  0xf4   : > { %4789 = vmatpush3.bf16.msra.mxu0 %v5776_v12  ;;  %3920 = vmatprep.mubr.msk.f32.mxu0 %vm5618_vm0, %v7665_v34 }
  0xf5   : > { %4790 = vmatprep.subr.bf16.mxu0 %v7673_v9 }
  0xf7   : > { %3921 = vmatmul.mubr.f32.gmra.mrb[2].mxu0 %v5892_v58  ;;  %v4821_v58 = vpack.c.bf16 %v7695_v45, %v7694_v42 }
  0xf8   : > { %3923 = vmatprep.mubr.msk.f32.mxu0 %vm5618_vm0, %v7665_v34  ;;  %4792 = vmatpush3.bf16.msra.mxu0 %v5779_v13 }
  0xf9   : > { %4793 = vmatprep.subr.bf16.mxu0 %v7673_v9 }
  0xfb   : > { %3924 = vmatmul.mubr.f32.gmra.mrb[4].mxu0 %v5927_v11  ;;  %v7698_v11 = vand.u32 4294901760, %v5953_v35  ;;  %v7704_v35 = vand.u32 4294901760, %v6027_v16  ;;  %v7709_v16 = vand.u32 4294901760, %v6101_v41 }
  0xfc   : > { %3926 = vmatprep.mubr.msk.f32.mxu0 %vm5618_vm0, %v7665_v34  ;;  %4795 = vmatpush3.bf16.msra.mxu0 %v5789_v18 }
  0xfd   : > { %4796 = vmatprep.subr.bf16.mxu0 %v7673_v9 }
  0xff   : > { %3927 = vmatmul.mubr.f32.gmra.mrb[6].mxu0 %v5940_v19  ;;  %v7701_v19 = vand.u32 4294901760, %v5990_v33  ;;  %v7706_v33 = vand.u32 4294901760, %v6032_v10  ;;  %v7710_v10 = vand.u32 4294901760, %v7681_v21 }
 0x100   : > { %3929 = vmatprep.mubr.msk.f32.mxu0 %vm5618_vm0, %v7665_v34  ;;  %4798 = vmatpush3.bf16.msra.mxu0 %v5803_v23 }
 0x101   : > { %4799 = vmatprep.subr.bf16.mxu0 %v7673_v9  ;;  %v4827_v63 = vpack.c.bf16 %v7701_v19, %v7700_v5 }
 0x103   : > { %3930 = vmatmul.mubr.f32.gmra.mrb[8].mxu0 %v5943_v20  ;;  %v7703_v20 = vand.u32 4294901760, %v6001_v28  ;;  %v7708_v28 = vand.u32 4294901760, %v6077_v8 }
 0x104   : > { %3932 = vmatprep.mubr.msk.f32.mxu0 %vm5618_vm0, %v7665_v34  ;;  %4801 = vmatpush3.bf16.msra.mxu0 %v5830_v32 }
 0x105   : > { %4802 = vmatprep.subr.bf16.mxu0 %v7673_v9 }
 0x107   : > { %3933 = vmatmul.mubr.f32.gmra.mrb[10].mxu0 %v6013_v62 }
 0x108   : > { %3935 = vmatprep.mubr.msk.f32.mxu0 %vm5618_vm0, %v7665_v34  ;;  %4804 = vmatpush3.bf16.msra.mxu0 %v5872_v46 }
 0x109   : > { %4805 = vmatprep.subr.bf16.mxu0 %v7673_v9 }
 0x10b   : > { %3936 = vmatmul.mubr.f32.gmra.mrb[12].mxu0 %v6043_v37  ;;  %v7713_v37 = vand.u32 4294901760, %v7684_v54 }
 0x10c   : > { %3938 = vmatprep.mubr.msk.f32.mxu0 %vm5618_vm0, %v7665_v34  ;;  %4807 = vmatpush3.bf16.msra.mxu0 %v5903_v61 }
 0x10d   : > { %4808 = vmatprep.subr.bf16.mxu0 %v7673_v9 }
 0x10f   : > { %3939 = vmatmul.mubr.f32.gmra.mrb[14].mxu0 %v6077_v8  ;;  %v7711_v8 = vand.u32 4294901760, %v7682_v48 }
 0x110   : > { %3941 = vmatprep.mubr.msk.f32.mxu0 %vm5618_vm0, %v7665_v34  ;;  %4810 = vmatpush3.bf16.msra.mxu0 %v5920_v6 }
 0x111   : > { %4811 = vmatprep.subr.bf16.mxu0 %v7673_v9 }
 0x113   : > { %3942 = vmatmul.mubr.f32.gmra.mrb[16].mxu0 %v6101_v41  ;;  %v7714_v41 = vand.u32 4294901760, %v6168_v49 }
 0x114   : > { %3944 = vmatprep.mubr.msk.f32.mxu0 %vm5618_vm0, %v7665_v34 }
 0x117   : > { %3945 = vmatmul.mubr.f32.gmra.mrb[18].mxu0 %v7681_v21  ;;  %v7717_v21 = vand.u32 4294901760, %v6207_v15 }
 0x118   : > { %3947 = vmatprep.mubr.msk.f32.mxu0 %vm5618_vm0, %v7665_v34 }
 0x11b   : > { %3948 = vmatmul.mubr.f32.gmra.mrb[20].mxu0 %v7682_v48  ;;  %v1645_v48 = vld [vmem:[%s7552_s3 + $0x18] sm:$0xff] }
 0x11c   : > { %3950 = vmatprep.mubr.msk.f32.mxu0 %vm5618_vm0, %v7665_v34 }
 0x11f   : > { %3951 = vmatmul.mubr.f32.gmra.mrb[22].mxu0 %v7683_v22 }
 0x120   : > { %3953 = vmatprep.mubr.msk.f32.mxu0 %vm5618_vm0, %v7665_v34 }
 0x123   : > { %3954 = vmatmul.mubr.f32.gmra.mrb[24].mxu0 %v7684_v54  ;;  %v1646_v54 = vld [vmem:[%s7552_s3 + $0x20] sm:$0xff] }
 0x124   : > { %3956 = vmatprep.mubr.msk.f32.mxu0 %vm5618_vm0, %v7665_v34 }
 0x127   : > { %3957 = vmatmul.mubr.f32.gmra.mrb[26].mxu0 %v6168_v49  ;;  %v1643_v49 = vld [vmem:[%s7552_s3 + $0x8] sm:$0xff] }
 0x128   : > { %3959 = vmatprep.mubr.msk.f32.mxu0 %vm5618_vm0, %v7665_v34 }
 0x12b   : > { %3960 = vmatmul.mubr.f32.gmra.mrb[28].mxu0 %v6184_v53 }
 0x12c   : > { %3962 = vmatprep.mubr.msk.f32.mxu0 %vm5618_vm0, %v7665_v34 }
 0x12f   : > { %3963 = vmatmul.mubr.f32.gmra.mrb[30].mxu0 %v6196_v40  ;;  %v1642_v40 = vld [vmem:[%s7552_s3] sm:$0xff] }
 0x130   : > { %3965 = vmatprep.mubr.msk.f32.mxu0 %vm5618_vm0, %v7665_v34 }
 0x133   : > { %3966 = vmatmul.mubr.f32.gmra.mrb[32].mxu0 %v6207_v15  ;;  %v1664_v15 = vand.u32 4294901760, %v1643_v49 }
 0x134   : > { %4000 = vmatprep.mubr.msk.f32.mxu0 %vm5618_vm0, %v7665_v34 }
 0x137   : > { %4001 = vmatmul.mubr.f32.vlgmr.msra.gmra.mrb[0].mxu0 %v7687_v43  ;;  %v7715_v43 = vand.u32 4294901760, %v6184_v53  ;;  %v1644_v53 = vld [vmem:[%s7552_s3 + $0x10] sm:$0xff] }
 0x138   : > { %4813 = vmatpush3.bf16.msra.mxu0 %v4812_v0  ;;  %4003 = vmatprep.mubr.msk.f32.mxu0 %vm5618_vm0, %v7665_v34  ;;  %v7692_v0 = vand.u32 4294901760, %v5896_v60  ;;  %v7697_v60 = vand.u32 4294901760, %v5948_v26  ;;  %v7702_v26 = vand.u32 4294901760, %v6013_v62  ;;  %v7707_v62 = vand.u32 4294901760, %v6039_v17 }
 0x139   : > { %4814 = vmatprep.subr.bf16.mxu0 %v7673_v9  ;;  %v7712_v17 = vand.u32 4294901760, %v7683_v22  ;;  %v1667_v22 = vand.u32 4294901760, %v1644_v53 }
 0x13a   : > { %v4818_v30 = vpack.c.bf16 %v7692_v0, %v7691_v29  ;;  %v4833_v38 = vpack.c.bf16 %v7707_v62, %v7706_v33  ;;  %v1670_v29 = vand.u32 4294901760, %v1645_v48  ;;  %v1673_v0 = vand.u32 4294901760, %v1646_v54  ;;  %v1656_v33 = vld [vmem:[%s7552_s3 + $0x70] sm:$0xff]  ;;  %v1657_v62 = vld [vmem:[%s7552_s3 + $0x78] sm:$0xff] }
 0x13b   : > { %4004 = vmatmul.mubr.f32.gmra.mrb[2].mxu0 %v7690_v24  ;;  %v4830_v24 = vpack.c.bf16 %v7704_v35, %v7703_v20 }
 0x13c   : > { %4006 = vmatprep.mubr.msk.f32.mxu0 %vm5618_vm0, %v7665_v34  ;;  %4816 = vmatpush3.bf16.msra.mxu0 %v4815_v52  ;;  %v4824_v52 = vpack.c.bf16 %v7698_v11, %v7697_v60  ;;  %v6527_v60 = vsub.f32 %v1645_v48, %v1670_v29  ;;  %v6529_v11 = vsub.f32 %v1646_v54, %v1673_v0 }
 0x13d   : > { %4817 = vmatprep.subr.bf16.mxu0 %v7673_v9  ;;  %v6538_v19 = vpack.c.bf16 %v1670_v29, %v1667_v22 }
 0x13f   : > { %4007 = vmatmul.mubr.f32.gmra.mrb[4].mxu0 %v7693_v39  ;;  %v1649_v39 = vld [vmem:[%s7552_s3 + $0x38] sm:$0xff] }
 0x140   : > { %4009 = vmatprep.mubr.msk.f32.mxu0 %vm5618_vm0, %v7665_v34  ;;  %4819 = vmatpush3.bf16.msra.mxu0 %v4818_v30  ;;  %v1648_v30 = vld [vmem:[%s7552_s3 + $0x30] sm:$0xff]  ;;  %v1682_v5 = vand.u32 4294901760, %v1649_v39 }
 0x141   : > { %4820 = vmatprep.subr.bf16.mxu0 %v7673_v9 }
 0x143   : > { %4010 = vmatmul.mubr.f32.gmra.mrb[6].mxu0 %v7696_v50  ;;  %v6524_v50 = vsub.f32 %v1644_v53, %v1667_v22  ;;  %v7619_v22 = vand.u32 4294901760, %v6527_v60 }
 0x144   : > { %4012 = vmatprep.mubr.msk.f32.mxu0 %vm5618_vm0, %v7665_v34  ;;  %4822 = vmatpush3.bf16.msra.mxu0 %v4821_v58  ;;  %v6522_v58 = vsub.f32 %v1643_v49, %v1664_v15 }
 0x145   : > { %4823 = vmatprep.subr.bf16.mxu0 %v7673_v9  ;;  %v7621_v48 = vand.u32 4294901760, %v6524_v50 }
 0x147   : > { %4013 = vmatmul.mubr.f32.gmra.mrb[8].mxu0 %v7699_v4  ;;  %v1679_v4 = vand.u32 4294901760, %v1648_v30  ;;  %v1929_v54 = vsub.f32 %v6524_v50, %v7621_v48 }
 0x148   : > { %4015 = vmatprep.mubr.msk.f32.mxu0 %vm5618_vm0, %v7665_v34  ;;  %4825 = vmatpush3.bf16.msra.mxu0 %v4824_v52 }
 0x149   : > { %4826 = vmatprep.subr.bf16.mxu0 %v7673_v9  ;;  %v1930_v29 = vand.u32 4294901760, %v1929_v54 }
 0x14b   : > { %4016 = vmatmul.mubr.f32.gmra.mrb[10].mxu0 %v7702_v26  ;;  %v6543_v26 = vsub.f32 %v1649_v39, %v1682_v5 }
 0x14c   : > { %4018 = vmatprep.mubr.msk.f32.mxu0 %vm5618_vm0, %v7665_v34  ;;  %4828 = vmatpush3.bf16.msra.mxu0 %v4827_v63  ;;  %v6541_v63 = vsub.f32 %v1648_v30, %v1679_v4  ;;  %v7616_v30 = vand.u32 4294901760, %v6529_v11 }
 0x14d   : > { %4829 = vmatprep.subr.bf16.mxu0 %v7673_v9 }
 0x14f   : > { %4019 = vmatmul.mubr.f32.gmra.mrb[12].mxu0 %v7705_v7 }
 0x150   : > { %4021 = vmatprep.mubr.msk.f32.mxu0 %vm5618_vm0, %v7665_v34  ;;  %4831 = vmatpush3.bf16.msra.mxu0 %v4830_v24 }
 0x151   : > { %4832 = vmatprep.subr.bf16.mxu0 %v7673_v9 }
 0x153   : > { %4022 = vmatmul.mubr.f32.gmra.mrb[14].mxu0 %v7708_v28  ;;  %v1706_v28 = vand.u32 4294901760, %v1657_v62 }
 0x154   : > { %4024 = vmatprep.mubr.msk.f32.mxu0 %vm5618_vm0, %v7665_v34  ;;  %4834 = vmatpush3.bf16.msra.mxu0 %v4833_v38  ;;  %v1703_v38 = vand.u32 4294901760, %v1656_v33 }
 0x155   : > { %4835 = vmatprep.subr.bf16.mxu0 %v7673_v9 }
 0x157   : > { %4025 = vmatmul.mubr.f32.gmra.mrb[16].mxu0 %v7709_v16  ;;  %v6695_v16 = vpack.c.bf16 %v1706_v28, %v1703_v38 }
 0x158   : > { %4027 = vmatprep.mubr.msk.f32.mxu0 %vm5618_vm0, %v7665_v34 }
 0x15b   : > { %4028 = vmatmul.mubr.f32.gmra.mrb[18].mxu0 %v7710_v10 }
 0x15c   : > { %4030 = vmatprep.mubr.msk.f32.mxu0 %vm5618_vm0, %v7665_v34 }
 0x15f   : > { %4031 = vmatmul.mubr.f32.gmra.mrb[20].mxu0 %v7711_v8 }
 0x160   : > { %4033 = vmatprep.mubr.msk.f32.mxu0 %vm5618_vm0, %v7665_v34 }
 0x163   : > { %4034 = vmatmul.mubr.f32.gmra.mrb[22].mxu0 %v7712_v17 }
 0x164   : > { %4036 = vmatprep.mubr.msk.f32.mxu0 %vm5618_vm0, %v7665_v34 }
 0x167   : > { %4037 = vmatmul.mubr.f32.gmra.mrb[24].mxu0 %v7713_v37 }
 0x168   : > { %4039 = vmatprep.mubr.msk.f32.mxu0 %vm5618_vm0, %v7665_v34 }
 0x16b   : > { %4040 = vmatmul.mubr.f32.gmra.mrb[26].mxu0 %v7714_v41  ;;  %v6707_v41 = vsub.f32 %v1656_v33, %v1703_v38 }
 0x16c   : > { %4042 = vmatprep.mubr.msk.f32.mxu0 %vm5618_vm0, %v7665_v34 }
 0x16f   : > { %4043 = vmatmul.mubr.f32.gmra.mrb[28].mxu0 %v7715_v43  ;;  %v6709_v43 = vsub.f32 %v1657_v62, %v1706_v28 }
 0x170   : > { %4045 = vmatprep.mubr.msk.f32.mxu0 %vm5618_vm0, %v7665_v34 }
 0x173   : > { %4046 = vmatmul.mubr.f32.gmra.mrb[30].mxu0 %v7716_v47 }
 0x174   : > { %4048 = vmatprep.mubr.msk.f32.mxu0 %vm5618_vm0, %v7665_v34 }
 0x177   : > { %4049 = vmatmul.mubr.f32.gmra.mrb[32].mxu0 %v7717_v21  ;;  %v7625_v21 = vand.u32 4294901760, %v6522_v58 }
 0x178   : > { %4083 = vmatprep.mubr.msk.f32.mxu0 %vm5618_vm0, %v7665_v34 }
 0x179   : > { %v1922_v49 = vsub.f32 %v6522_v58, %v7625_v21 }
 0x17b   : > { %4084 = vmatmul.mubr.f32.vlgmr.msra.gmra.mrb[0].mxu0 %v5823_v31 }
 0x17c   : > { %4837 = vmatpush3.bf16.msra.mxu0 %v5776_v12  ;;  %4086 = vmatprep.mubr.msk.f32.mxu0 %vm5618_vm0, %v7665_v34  ;;  %v1661_v12 = vand.u32 4294901760, %v1642_v40 }
 0x17d   : > { %4838 = vmatprep.subr.bf16.mxu0 %v7673_v9 }
 0x17e   : > { %v6518_v42 = vpack.c.bf16 %v1664_v15, %v1661_v12  ;;  %v6520_v45 = vsub.f32 %v1642_v40, %v1661_v12  ;;  %v1923_v12 = vand.u32 4294901760, %v1922_v49 }
 0x17f   : > { %4087 = vmatmul.mubr.f32.gmra.mrb[2].mxu0 %v5863_v44 }
 0x180   : > { %4089 = vmatprep.mubr.msk.f32.mxu0 %vm5618_vm0, %v7665_v34  ;;  %4840 = vmatpush3.bf16.msra.mxu0 %v5779_v13  ;;  %v1676_v13 = vand.u32 4294901760, %v1647_v27  ;;  %v7627_v47 = vand.u32 4294901760, %v6520_v45 }
 0x181   : > { %4841 = vmatprep.subr.bf16.mxu0 %v7673_v9  ;;  %4861 = vmatpush3.bf16.msra.mxu1 %v6518_v42 }
 0x182   : > { %v6534_v52 = vsub.f32 %v1647_v27, %v1676_v13  ;;  %4862 = vmatprep.subr.bf16.mxu1 %v7673_v9  ;;  %v1915_v40 = vsub.f32 %v6520_v45, %v7627_v47  ;;  %v1936_v27 = vsub.f32 %v6527_v60, %v7619_v22 }
 0x183   : > { %4090 = vmatmul.mubr.f32.gmra.mrb[4].mxu0 %v5894_v59 }
 0x184   : > { %4092 = vmatprep.mubr.msk.f32.mxu0 %vm5618_vm0, %v7665_v34  ;;  %4843 = vmatpush3.bf16.msra.mxu0 %v5789_v18  ;;  %v6551_v18 = vpack.c.bf16 %v1676_v13, %v1673_v0  ;;  %v1916_v53 = vand.u32 4294901760, %v1915_v40  ;;  %v1937_v0 = vand.u32 4294901760, %v1936_v27  ;;  %v7614_v39 = vand.u32 4294901760, %v6534_v52 }
 0x185   : > { %4844 = vmatprep.subr.bf16.mxu0 %v7673_v9  ;;  %4864 = vmatpush3.bf16.msra.mxu1 %v6538_v19 }
 0x186   : > { %4865 = vmatprep.subr.bf16.mxu1 %v7673_v9  ;;  %v6719_v15 = vpack.c.bf16 %v1923_v12, %v1916_v53  ;;  %v6729_v13 = vpack.c.bf16 %v1937_v0, %v1930_v29 }
 0x187   : > { %4093 = vmatmul.mubr.f32.gmra.mrb[6].mxu0 %v5908_v2 }
 0x188   : > { %4095 = vmatprep.mubr.msk.f32.mxu0 %vm5618_vm0, %v7665_v34  ;;  %4846 = vmatpush3.bf16.msra.mxu0 %v5803_v23  ;;  %v6560_v23 = vpack.c.bf16 %v1682_v5, %v1679_v4  ;;  %v1943_v4 = vsub.f32 %v6529_v11, %v7616_v30  ;;  %v1950_v5 = vsub.f32 %v6534_v52, %v7614_v39 }
 0x189   : > { %4847 = vmatprep.subr.bf16.mxu0 %v7673_v9  ;;  %4867 = vmatpush3.bf16.msra.mxu1 %v6551_v18 }
 0x18a   : > { %4868 = vmatprep.subr.bf16.mxu1 %v7673_v9 }
 0x18b   : > { %4096 = vmatmul.mubr.f32.gmra.mrb[8].mxu0 %v5910_v3 }
 0x18c   : > { %4098 = vmatprep.mubr.msk.f32.mxu0 %vm5618_vm0, %v7665_v34  ;;  %4849 = vmatpush3.bf16.msra.mxu0 %v5830_v32  ;;  %v7718_v32 = vld [vmem:[#allocation10_spill] sm:$0xff] }
 0x18d   : > { %4850 = vmatprep.subr.bf16.mxu0 %v7673_v9  ;;  %4870 = vmatpush3.bf16.msra.mxu1 %v6560_v23 }
 0x18e   : > { %4871 = vmatprep.subr.bf16.mxu1 %v7673_v9 }
 0x18f   : > { %4099 = vmatmul.mubr.f32.gmra.mrb[10].mxu0 %v5977_v14 }
 0x190   : > { %4101 = vmatprep.mubr.msk.f32.mxu0 %vm5618_vm0, %v7665_v34  ;;  %4852 = vmatpush3.bf16.msra.mxu0 %v5872_v46  ;;  %v7719_v46 = vld [vmem:[#allocation12_spill] sm:$0xff] }
 0x191   : > { %4853 = vmatprep.subr.bf16.mxu0 %v7673_v9 }
 0x193   : > { %4102 = vmatmul.mubr.f32.gmra.mrb[12].mxu0 %v6010_v57 }
 0x194   : > { %4104 = vmatprep.mubr.msk.f32.mxu0 %vm5618_vm0, %v7665_v34  ;;  %4855 = vmatpush3.bf16.msra.mxu0 %v5903_v61  ;;  %v7720_v61 = vld [vmem:[#allocation13_spill] sm:$0xff] }
 0x195   : > { %4856 = vmatprep.subr.bf16.mxu0 %v7673_v9 }
 0x197   : > { %4105 = vmatmul.mubr.f32.gmra.mrb[14].mxu0 %v6046_v51 }
 0x198   : > { %4107 = vmatprep.mubr.msk.f32.mxu0 %vm5618_vm0, %v7665_v34  ;;  %4858 = vmatpush3.bf16.msra.mxu0 %v5920_v6  ;;  %v7721_v6 = vld [vmem:[#allocation14_spill] sm:$0xff] }
 0x19b   : > { %4108 = vmatmul.mubr.f32.gmra.mrb[16].mxu0 %v6067_v36 }
 0x19c   : > { %4110 = vmatprep.mubr.msk.f32.mxu0 %vm5618_vm0, %v7665_v34 }
 0x19f   : > { %4111 = vmatmul.mubr.f32.gmra.mrb[18].mxu0 %v6104_v25 }
 0x1a0   : > { %4113 = vmatprep.mubr.msk.f32.mxu0 %vm5618_vm0, %v7665_v34 }
 0x1a3   : > { %4114 = vmatmul.mubr.f32.gmra.mrb[20].mxu0 %v6123_v56 }
 0x1a4   : > { %4116 = vmatprep.mubr.msk.f32.mxu0 %vm5618_vm0, %v7665_v34 }
 0x1a7   : > { %4117 = vmatmul.mubr.f32.gmra.mrb[22].mxu0 %v6136_v1 }
 0x1a8   : > { %4119 = vmatprep.mubr.msk.f32.mxu0 %vm5618_vm0, %v7665_v34 }
 0x1ab   : > { %4120 = vmatmul.mubr.f32.gmra.mrb[24].mxu0 %v6149_v55 }
 0x1ac   : > { %4122 = vmatprep.mubr.msk.f32.mxu0 %vm5618_vm0, %v7665_v34 }
 0x1af   : > { %4123 = vmatmul.mubr.f32.gmra.mrb[26].mxu0 %v7718_v32 }
 0x1b0   : > { %4125 = vmatprep.mubr.msk.f32.mxu0 %vm5618_vm0, %v7665_v34 }
 0x1b3   : > { %4126 = vmatmul.mubr.f32.gmra.mrb[28].mxu0 %v7719_v46 }
 0x1b4   : > { %4128 = vmatprep.mubr.msk.f32.mxu0 %vm5618_vm0, %v7665_v34 }
 0x1b7   : > { %4129 = vmatmul.mubr.f32.gmra.mrb[30].mxu0 %v7720_v61 }
 0x1b8   : > { %4131 = vmatprep.mubr.msk.f32.mxu0 %vm5618_vm0, %v7665_v34 }
 0x1bb   : > { %4132 = vmatmul.mubr.f32.gmra.mrb[32].mxu0 %v7721_v6 }
 0x1bc   : > { %4166 = vmatprep.mubr.msk.f32.mxu0 %vm5618_vm0, %v7665_v34 }
 0x1bf   : > { %4167 = vmatmul.mubr.f32.vlgmr.msra.gmra.mrb[0].mxu0 %v5823_v31  ;;  %v1651_v31 = vld [vmem:[%s7552_s3 + $0x48] sm:$0xff] }
 0x1c0   : > { %4169 = vmatprep.mubr.msk.f32.mxu0 %vm5618_vm0, %v7665_v34 }
 0x1c3   : > { %4170 = vmatmul.mubr.f32.gmra.mrb[2].mxu0 %v5863_v44 }
 0x1c4   : > { %4172 = vmatprep.mubr.msk.f32.mxu0 %vm5618_vm0, %v7665_v34 }
 0x1c7   : > { %4173 = vmatmul.mubr.f32.gmra.mrb[4].mxu0 %v5894_v59  ;;  %v1688_v59 = vand.u32 4294901760, %v1651_v31 }
 0x1c8   : > { %4175 = vmatprep.mubr.msk.f32.mxu0 %vm5618_vm0, %v7665_v34 }
 0x1c9   : > { %v6685_v7 = vsub.f32 %v1651_v31, %v1688_v59 }
 0x1cb   : > { %4176 = vmatmul.mubr.f32.gmra.mrb[6].mxu0 %v5908_v2 }
 0x1cc   : > { %4178 = vmatprep.mubr.msk.f32.mxu0 %vm5618_vm0, %v7665_v34 }
 0x1cf   : > { %4179 = vmatmul.mubr.f32.gmra.mrb[8].mxu0 %v5910_v3  ;;  %v1652_v3 = vld [vmem:[%s7552_s3 + $0x50] sm:$0xff] }
 0x1d0   : > { %4181 = vmatprep.mubr.msk.f32.mxu0 %vm5618_vm0, %v7665_v34 }
 0x1d3   : > { %4182 = vmatmul.mubr.f32.gmra.mrb[10].mxu0 %v5977_v14  ;;  %v1653_v14 = vld [vmem:[%s7552_s3 + $0x58] sm:$0xff] }
 0x1d4   : > { %4184 = vmatprep.mubr.msk.f32.mxu0 %vm5618_vm0, %v7665_v34 }
 0x1d7   : > { %4185 = vmatmul.mubr.f32.gmra.mrb[12].mxu0 %v6010_v57  ;;  %v1691_v57 = vand.u32 4294901760, %v1652_v3 }
 0x1d8   : > { %4187 = vmatprep.mubr.msk.f32.mxu0 %vm5618_vm0, %v7665_v34 }
 0x1d9   : > { %v6697_v10 = vsub.f32 %v1652_v3, %v1691_v57 }
 0x1db   : > { %4188 = vmatmul.mubr.f32.gmra.mrb[14].mxu0 %v6046_v51  ;;  %v1694_v51 = vand.u32 4294901760, %v1653_v14  ;;  %v7609_v62 = vand.u32 4294901760, %v6697_v10 }
 0x1dc   : > { %4190 = vmatprep.mubr.msk.f32.mxu0 %vm5618_vm0, %v7665_v34 }
 0x1dd   : > { %v6699_v8 = vsub.f32 %v1653_v14, %v1694_v51  ;;  %v1985_v28 = vsub.f32 %v6697_v10, %v7609_v62 }
 0x1df   : > { %4191 = vmatmul.mubr.f32.gmra.mrb[16].mxu0 %v6067_v36  ;;  %v6671_v36 = vpack.c.bf16 %v1694_v51, %v1691_v57  ;;  %v7610_v51 = vand.u32 4294901760, %v6685_v7  ;;  %v7608_v38 = vand.u32 4294901760, %v6699_v8  ;;  %v1986_v49 = vand.u32 4294901760, %v1985_v28 }
 0x1e0   : > { %4193 = vmatprep.mubr.msk.f32.mxu0 %vm5618_vm0, %v7665_v34 }
 0x1e1   : > { %v1992_v40 = vsub.f32 %v6699_v8, %v7608_v38 }
 0x1e3   : > { %4194 = vmatmul.mubr.f32.gmra.mrb[18].mxu0 %v6104_v25  ;;  %v1654_v25 = vld [vmem:[%s7552_s3 + $0x60] sm:$0xff]  ;;  %v1993_v53 = vand.u32 4294901760, %v1992_v40 }
 0x1e4   : > { %4196 = vmatprep.mubr.msk.f32.mxu0 %vm5618_vm0, %v7665_v34 }
 0x1e5   : > { %v6769_v12 = vpack.c.bf16 %v1993_v53, %v1986_v49 }
 0x1e7   : > { %4197 = vmatmul.mubr.f32.gmra.mrb[20].mxu0 %v6123_v56  ;;  %v1655_v56 = vld [vmem:[%s7552_s3 + $0x68] sm:$0xff] }
 0x1e8   : > { %4199 = vmatprep.mubr.msk.f32.mxu0 %vm5618_vm0, %v7665_v34  ;;  %v1700_v20 = vand.u32 4294901760, %v1655_v56 }
 0x1ea   : > { %v6705_v37 = vsub.f32 %v1655_v56, %v1700_v20  ;;  %v1978_v56 = vsub.f32 %v6685_v7, %v7610_v51 }
 0x1eb   : > { %4200 = vmatmul.mubr.f32.gmra.mrb[22].mxu0 %v6136_v1  ;;  %v1650_v1 = vld [vmem:[%s7552_s3 + $0x40] sm:$0xff] }
 0x1ec   : > { %4202 = vmatprep.mubr.msk.f32.mxu0 %vm5618_vm0, %v7665_v34  ;;  %v1685_v44 = vand.u32 4294901760, %v1650_v1 }
 0x1ee   : > { %v6661_v2 = vpack.c.bf16 %v1688_v59, %v1685_v44  ;;  %v6683_v24 = vsub.f32 %v1650_v1, %v1685_v44  ;;  %v7612_v1 = vand.u32 4294901760, %v6543_v26 }
 0x1ef   : > { %4203 = vmatmul.mubr.f32.gmra.mrb[24].mxu0 %v6149_v55  ;;  %v1697_v55 = vand.u32 4294901760, %v1654_v25 }
 0x1f0   : > { %4205 = vmatprep.mubr.msk.f32.mxu0 %vm5618_vm0, %v7665_v34  ;;  %4873 = vmatpush3.bf16.msra.mxu1 %v6661_v2  ;;  %v1964_v44 = vsub.f32 %v6543_v26, %v7612_v1  ;;  %v7611_v57 = vand.u32 4294901760, %v6683_v24 }
 0x1f1   : > { %4874 = vmatprep.subr.bf16.mxu1 %v7673_v9  ;;  %v6681_v35 = vpack.c.bf16 %v1700_v20, %v1697_v55  ;;  %v6703_v17 = vsub.f32 %v1654_v25, %v1697_v55  ;;  %v1979_v20 = vand.u32 4294901760, %v1978_v56 }
 0x1f2   : > { %v1965_v3 = vand.u32 4294901760, %v1964_v44  ;;  %v1971_v25 = vsub.f32 %v6683_v24, %v7611_v57 }
 0x1f3   : > { %4206 = vmatmul.mubr.f32.gmra.mrb[26].mxu0 %v7718_v32  ;;  %v1944_v32 = vand.u32 4294901760, %v1943_v4 }
 0x1f4   : > { %4208 = vmatprep.mubr.msk.f32.mxu0 %vm5618_vm0, %v7665_v34  ;;  %4876 = vmatpush3.bf16.msra.mxu1 %v6671_v36  ;;  %v1972_v55 = vand.u32 4294901760, %v1971_v25 }
 0x1f5   : > { %4877 = vmatprep.subr.bf16.mxu1 %v7673_v9 }
 0x1f6   : > { %v6759_v33 = vpack.c.bf16 %v1979_v20, %v1972_v55 }
 0x1f7   : > { %4209 = vmatmul.mubr.f32.gmra.mrb[28].mxu0 %v7719_v46  ;;  %v1951_v46 = vand.u32 4294901760, %v1950_v5  ;;  %v6784_v5 = vld [vmem:[%s7551_s2] ss:$0 sm:$0xff] }
 0x1f8   : > { %4211 = vmatprep.mubr.msk.f32.mxu0 %vm5618_vm0, %v7665_v34  ;;  %4879 = vmatpush3.bf16.msra.mxu1 %v6681_v35 }
 0x1f9   : > { %4880 = vmatprep.subr.bf16.mxu1 %v7673_v9 }
 0x1fb   : > { %4212 = vmatmul.mubr.f32.gmra.mrb[30].mxu0 %v7720_v61  ;;  %v6739_v61 = vpack.c.bf16 %v1951_v46, %v1944_v32 }
 0x1fc   : > { %4214 = vmatprep.mubr.msk.f32.mxu0 %vm5618_vm0, %v7665_v34  ;;  %4882 = vmatpush3.bf16.msra.mxu1 %v6695_v16 }
 0x1fd   : > { %4883 = vmatprep.subr.bf16.mxu1 %v7673_v9 }
 0x1ff   : > { %4215 = vmatmul.mubr.f32.gmra.mrb[32].mxu0 %v7721_v6  ;;  %v7613_v6 = vand.u32 4294901760, %v6541_v63 }
 0x201   : > { %v1957_v31 = vsub.f32 %v6541_v63, %v7613_v6 }
 0x203   : > { %v1958_v59 = vand.u32 4294901760, %v1957_v31 }
 0x205   : > { %v6749_v14 = vpack.c.bf16 %v1965_v3, %v1958_v59 }
 0x292   : > { %v1525_v46 = vpop.f32.mrb[0].mxu0 }
 0x293   : > { %v5003_v31 = vadd.f32 %v6784_v5, %v1525_v46  ;;  %v4168_v44 = vpop.f32.mrb[1].mxu0 }
 0x295   : > { %v1625_v59 = vmax.f32 %v5003_v31, 0.0 }
 0x296   : > { %v1531_v3 = vpop.f32.mrb[2].mxu0 }
 0x297   : > { %v6789_v25 = vand.u32 4294901760, %v1625_v59  ;;  %v5004_v56 = vadd.f32 %v6784_v5, %v1531_v3  ;;  %v4171_v55 = vpop.f32.mrb[3].mxu0 }
 0x299   : > { %v6793_v20 = vsub.f32 %v1625_v59, %v6789_v25  ;;  %v1626_v28 = vmax.f32 %v5004_v56, 0.0 }
 0x29a   : > { %v1537_v40 = vpop.f32.mrb[4].mxu0 }
 0x29b   : > { %v6795_v49 = vand.u32 4294901760, %v1626_v28  ;;  %v5005_v53 = vadd.f32 %v6784_v5, %v1537_v40  ;;  %v4174_v38 = vpop.f32.mrb[5].mxu0  ;;  %v7623_v46 = vand.u32 4294901760, %v6793_v20 }
 0x29d   : > { %v6800_v31 = vsub.f32 %v1626_v28, %v6795_v49  ;;  %v1627_v44 = vmax.f32 %v5005_v53, 0.0  ;;  %v1744_v3 = vsub.f32 %v6793_v20, %v7623_v46 }
 0x29e   : > { %v1543_v55 = vpop.f32.mrb[6].mxu0 }
 0x29f   : > { %v6805_v59 = vand.u32 4294901760, %v1627_v44  ;;  %v5006_v56 = vadd.f32 %v6784_v5, %v1543_v55  ;;  %v4177_v62 = vpop.f32.mrb[7].mxu0  ;;  %v1745_v51 = vand.u32 4294901760, %v1744_v3  ;;  %v7618_v40 = vand.u32 4294901760, %v6800_v31 }
 0x2a1   : > { %v6810_v38 = vsub.f32 %v1627_v44, %v6805_v59  ;;  %v1628_v57 = vmax.f32 %v5006_v56, 0.0  ;;  %4250 = vmatmul.mubr.f32.vlgmr.msra.gmra.mrb[0].mxu1 %v1745_v51  ;;  %v1754_v28 = vsub.f32 %v6800_v31, %v7618_v40 }
 0x2a2   : > { %v1549_v53 = vpop.f32.mrb[8].mxu0  ;;  %4885 = vmatpush3.bf16.msra.mxu1 %v6719_v15  ;;  %4252 = vmatprep.mubr.msk.f32.mxu1 %vm5618_vm0, %v7665_v34 }
 0x2a3   : > { %v6818_v55 = vand.u32 4294901760, %v1628_v57  ;;  %v5007_v62 = vadd.f32 %v6784_v5, %v1549_v53  ;;  %v4180_v3 = vpop.f32.mrb[9].mxu0  ;;  %v1755_v1 = vand.u32 4294901760, %v1754_v28  ;;  %v7615_v44 = vand.u32 4294901760, %v6810_v38  ;;  %4886 = vmatprep.subr.bf16.mxu1 %v7673_v9 }
 0x2a5   : > { %v6824_v51 = vsub.f32 %v1628_v57, %v6818_v55  ;;  %v1629_v56 = vmax.f32 %v5007_v62, 0.0  ;;  %4253 = vmatmul.mubr.f32.gmra.mrb[2].mxu1 %v1755_v1  ;;  %v1764_v15 = vsub.f32 %v6810_v38, %v7615_v44 }
 0x2a6   : > { %v1555_v6 = vpop.f32.mrb[10].mxu0  ;;  %4255 = vmatprep.mubr.msk.f32.mxu1 %vm5618_vm0, %v7665_v34  ;;  %4888 = vmatpush3.bf16.msra.mxu1 %v6729_v13 }
 0x2a7   : > { %v6832_v28 = vand.u32 4294901760, %v1629_v56  ;;  %v5008_v53 = vadd.f32 %v6784_v5, %v1555_v6  ;;  %v4183_v3 = vpop.f32.mrb[11].mxu0  ;;  %v1765_v39 = vand.u32 4294901760, %v1764_v15  ;;  %v7617_v57 = vand.u32 4294901760, %v6824_v51  ;;  %4889 = vmatprep.subr.bf16.mxu1 %v7673_v9 }
 0x2a8   : > { %v7622_v6 = vand.u32 4294901760, %v6703_v17  ;;  %v7624_v15 = vand.u32 4294901760, %v6705_v37 }
 0x2a9   : > { %v6838_v1 = vsub.f32 %v1629_v56, %v6832_v28  ;;  %v1630_v62 = vmax.f32 %v5008_v53, 0.0  ;;  %4256 = vmatmul.mubr.f32.gmra.mrb[4].mxu1 %v1765_v39  ;;  %v1774_v44 = vsub.f32 %v6824_v51, %v7617_v57 }
 0x2aa   : > { %v1561_v13 = vpop.f32.mrb[12].mxu0  ;;  %4258 = vmatprep.mubr.msk.f32.mxu1 %vm5618_vm0, %v7665_v34  ;;  %4891 = vmatpush3.bf16.msra.mxu1 %v6739_v61 }
 0x2ab   : > { %v6848_v3 = vand.u32 4294901760, %v1630_v62  ;;  %v5009_v56 = vadd.f32 %v6784_v5, %v1561_v13  ;;  %v4186_v53 = vpop.f32.mrb[13].mxu0  ;;  %v1775_v39 = vand.u32 4294901760, %v1774_v44  ;;  %v7620_v30 = vand.u32 4294901760, %v6838_v1  ;;  %4892 = vmatprep.subr.bf16.mxu1 %v7673_v9 }
 0x2ac   : > { %v1999_v44 = vsub.f32 %v6703_v17, %v7622_v6  ;;  %v7629_v13 = vand.u32 4294901760, %v6707_v41 }
 0x2ad   : > { %v6854_v57 = vsub.f32 %v1630_v62, %v6848_v3  ;;  %v1631_v40 = vmax.f32 %v5009_v56, 0.0  ;;  %4259 = vmatmul.mubr.f32.gmra.mrb[6].mxu1 %v1775_v39  ;;  %v1784_v61 = vsub.f32 %v6838_v1, %v7620_v30  ;;  %v2006_v62 = vsub.f32 %v6705_v37, %v7624_v15 }
 0x2ae   : > { %v1567_v22 = vpop.f32.mrb[14].mxu0  ;;  %4261 = vmatprep.mubr.msk.f32.mxu1 %vm5618_vm0, %v7665_v34  ;;  %4894 = vmatpush3.bf16.msra.mxu1 %v6749_v14  ;;  %v7628_v56 = vand.u32 4294901760, %v6709_v43 }
 0x2af   : > { %v6870_v53 = vand.u32 4294901760, %v1631_v40  ;;  %v5010_v39 = vadd.f32 %v6784_v5, %v1567_v22  ;;  %v4189_v30 = vpop.f32.mrb[15].mxu0  ;;  %v1785_v48 = vand.u32 4294901760, %v1784_v61  ;;  %v7626_v14 = vand.u32 4294901760, %v6854_v57  ;;  %4895 = vmatprep.subr.bf16.mxu1 %v7673_v9 }
 0x2b0   : > { %v2000_v22 = vand.u32 4294901760, %v1999_v44  ;;  %v2007_v30 = vand.u32 4294901760, %v2006_v62  ;;  %v2013_v61 = vsub.f32 %v6707_v41, %v7629_v13 }
 0x2b1   : > { %v6876_v6 = vsub.f32 %v1631_v40, %v6870_v53  ;;  %v1632_v46 = vmax.f32 %v5010_v39, 0.0  ;;  %4262 = vmatmul.mubr.f32.gmra.mrb[8].mxu1 %v1785_v48  ;;  %v1794_v15 = vsub.f32 %v6854_v57, %v7626_v14  ;;  %v2020_v48 = vsub.f32 %v6709_v43, %v7628_v56 }
 0x2b2   : > { %v1573_v21 = vpop.f32.mrb[16].mxu0  ;;  %4264 = vmatprep.mubr.msk.f32.mxu1 %vm5618_vm0, %v7665_v34  ;;  %4897 = vmatpush3.bf16.msra.mxu1 %v6759_v33 }
 0x2b3   : > { %v6890_v40 = vand.u32 4294901760, %v1632_v46  ;;  %v5011_v39 = vadd.f32 %v6784_v5, %v1573_v21  ;;  %v4192_v14 = vpop.f32.mrb[17].mxu0  ;;  %v1795_v47 = vand.u32 4294901760, %v1794_v15  ;;  %v7630_v32 = vand.u32 4294901760, %v6876_v6  ;;  %4898 = vmatprep.subr.bf16.mxu1 %v7673_v9 }
 0x2b4   : > { %v4902_v21 = vpack.c.bf16 %v2007_v30, %v2000_v22  ;;  %v2014_v15 = vand.u32 4294901760, %v2013_v61  ;;  %v2021_v14 = vand.u32 4294901760, %v2020_v48 }
 0x2b5   : > { %v6896_v33 = vsub.f32 %v1632_v46, %v6890_v40  ;;  %v1633_v44 = vmax.f32 %v5011_v39, 0.0  ;;  %4265 = vmatmul.mubr.f32.gmra.mrb[10].mxu1 %v1795_v47  ;;  %v1804_v62 = vsub.f32 %v6876_v6, %v7630_v32 }
 0x2b6   : > { %v1579_v56 = vpop.f32.mrb[18].mxu0  ;;  %4267 = vmatprep.mubr.msk.f32.mxu1 %vm5618_vm0, %v7665_v34  ;;  %4900 = vmatpush3.bf16.msra.mxu1 %v6769_v12 }
 0x2b7   : > { %v6904_v13 = vand.u32 4294901760, %v1633_v44  ;;  %v5012_v46 = vadd.f32 %v6784_v5, %v1579_v56  ;;  %v4195_v4 = vpop.f32.mrb[19].mxu0  ;;  %v1805_v39 = vand.u32 4294901760, %v1804_v62  ;;  %v7632_v47 = vand.u32 4294901760, %v6896_v33  ;;  %4901 = vmatprep.subr.bf16.mxu1 %v7673_v9 }
 0x2b8   : > { %v4905_v4 = vpack.c.bf16 %v2021_v14, %v2014_v15 }
 0x2b9   : > { %v6910_v32 = vsub.f32 %v1633_v44, %v6904_v13  ;;  %v1634_v0 = vmax.f32 %v5012_v46, 0.0  ;;  %4268 = vmatmul.mubr.f32.gmra.mrb[12].mxu1 %v1805_v39  ;;  %v1814_v12 = vsub.f32 %v6896_v33, %v7632_v47 }
 0x2ba   : > { %v1585_v22 = vpop.f32.mrb[20].mxu0  ;;  %4270 = vmatprep.mubr.msk.f32.mxu1 %vm5618_vm0, %v7665_v34  ;;  %4903 = vmatpush3.bf16.msra.mxu1 %v4902_v21 }
 0x2bb   : > { %7722 = vst [vmem:[#allocation7_spill] sm:$0xff] %v6910_v32  ;;  %v6917_v56 = vand.u32 4294901760, %v1634_v0  ;;  %v5013_v30 = vadd.f32 %v6784_v5, %v1585_v22  ;;  %v4198_v61 = vpop.f32.mrb[21].mxu0  ;;  %v1815_v48 = vand.u32 4294901760, %v1814_v12  ;;  %v7631_v44 = vand.u32 4294901760, %v6910_v32  ;;  %4904 = vmatprep.subr.bf16.mxu1 %v7673_v9 }
 0x2bd   : > { %v6923_v62 = vsub.f32 %v1634_v0, %v6917_v56  ;;  %v1635_v46 = vmax.f32 %v5013_v30, 0.0  ;;  %4271 = vmatmul.mubr.f32.gmra.mrb[14].mxu1 %v1815_v48  ;;  %v1824_v21 = vsub.f32 %v6910_v32, %v7631_v44 }
 0x2be   : > { %v1591_v15 = vpop.f32.mrb[22].mxu0  ;;  %4273 = vmatprep.mubr.msk.f32.mxu1 %vm5618_vm0, %v7665_v34  ;;  %4906 = vmatpush3.bf16.msra.mxu1 %v4905_v4 }
 0x2bf   : > { %7723 = vst [vmem:[#allocation8_spill] sm:$0xff] %v6923_v62  ;;  %v6930_v14 = vand.u32 4294901760, %v1635_v46  ;;  %v5014_v39 = vadd.f32 %v6784_v5, %v1591_v15  ;;  %v4201_v12 = vpop.f32.mrb[23].mxu0  ;;  %v1825_v22 = vand.u32 4294901760, %v1824_v21  ;;  %v7633_v0 = vand.u32 4294901760, %v6923_v62  ;;  %4907 = vmatprep.subr.bf16.mxu1 %v7673_v9 }
 0x2c1   : > { %v6936_v30 = vsub.f32 %v1635_v46, %v6930_v14  ;;  %v1636_v61 = vmax.f32 %v5014_v39, 0.0  ;;  %4274 = vmatmul.mubr.f32.gmra.mrb[16].mxu1 %v1825_v22  ;;  %v1834_v48 = vsub.f32 %v6923_v62, %v7633_v0 }
 0x2c2   : > { %v1597_v4 = vpop.f32.mrb[24].mxu0  ;;  %4276 = vmatprep.mubr.msk.f32.mxu1 %vm5618_vm0, %v7665_v34 }
 0x2c3   : > { %7724 = vst [vmem:[#allocation9_spill] sm:$0xff] %v6936_v30  ;;  %v6943_v15 = vand.u32 4294901760, %v1636_v61  ;;  %v5015_v21 = vadd.f32 %v6784_v5, %v1597_v4  ;;  %v4204_v12 = vpop.f32.mrb[25].mxu0  ;;  %v1835_v44 = vand.u32 4294901760, %v1834_v48  ;;  %v7634_v47 = vand.u32 4294901760, %v6936_v30 }
 0x2c5   : > { %v6948_v46 = vsub.f32 %v1636_v61, %v6943_v15  ;;  %v1637_v39 = vmax.f32 %v5015_v21, 0.0  ;;  %4277 = vmatmul.mubr.f32.gmra.mrb[18].mxu1 %v1835_v44  ;;  %v1844_v22 = vsub.f32 %v6936_v30, %v7634_v47 }
 0x2c6   : > { %v1603_v0 = vpop.f32.mrb[26].mxu0  ;;  %4279 = vmatprep.mubr.msk.f32.mxu1 %vm5618_vm0, %v7665_v34 }
 0x2c7   : > { %7725 = vst [vmem:[#allocation11_spill] sm:$0xff] %v6948_v46  ;;  %v6955_v29 = vand.u32 4294901760, %v1637_v39  ;;  %v5016_v4 = vadd.f32 %v6784_v5, %v1603_v0  ;;  %v4207_v48 = vpop.f32.mrb[27].mxu0  ;;  %v1845_v12 = vand.u32 4294901760, %v1844_v22  ;;  %v7637_v27 = vand.u32 4294901760, %v6948_v46 }
 0x2c9   : > { %v6960_v61 = vsub.f32 %v1637_v39, %v6955_v29  ;;  %v1638_v44 = vmax.f32 %v5016_v4, 0.0  ;;  %4280 = vmatmul.mubr.f32.gmra.mrb[20].mxu1 %v1845_v12  ;;  %v1854_v21 = vsub.f32 %v6948_v46, %v7637_v27 }
 0x2ca   : > { %v1609_v47 = vpop.f32.mrb[28].mxu0  ;;  %4282 = vmatprep.mubr.msk.f32.mxu1 %vm5618_vm0, %v7665_v34 }
 0x2cb   : > { %7726 = vst [vmem:[#allocation10_spill] sm:$0xff] %v6960_v61  ;;  %v6967_v54 = vand.u32 4294901760, %v1638_v44  ;;  %v5017_v0 = vadd.f32 %v6784_v5, %v1609_v47  ;;  %v4210_v22 = vpop.f32.mrb[29].mxu0  ;;  %v1855_v48 = vand.u32 4294901760, %v1854_v21  ;;  %v7642_v30 = vand.u32 4294901760, %v6960_v61 }
 0x2cd   : > { %7727 = vst [vmem:[#allocation12_spill] sm:$0xff] %v6967_v54  ;;  %v6972_v39 = vsub.f32 %v1638_v44, %v6967_v54  ;;  %v1639_v4 = vmax.f32 %v5017_v0, 0.0  ;;  %4283 = vmatmul.mubr.f32.gmra.mrb[22].mxu1 %v1855_v48  ;;  %v1864_v12 = vsub.f32 %v6960_v61, %v7642_v30 }
 0x2ce   : > { %v1615_v27 = vpop.f32.mrb[30].mxu0  ;;  %4285 = vmatprep.mubr.msk.f32.mxu1 %vm5618_vm0, %v7665_v34 }
 0x2cf   : > { %7728 = vst [vmem:[#allocation13_spill] sm:$0xff] %v6972_v39  ;;  %v6979_v46 = vand.u32 4294901760, %v1639_v4  ;;  %v5018_v47 = vadd.f32 %v6784_v5, %v1615_v27  ;;  %v4213_v21 = vpop.f32.mrb[31].mxu0  ;;  %v1865_v22 = vand.u32 4294901760, %v1864_v12  ;;  %v7647_v62 = vand.u32 4294901760, %v6972_v39 }
 0x2d1   : > { %7729 = vst [vmem:[#allocation14_spill] sm:$0xff] %v6979_v46  ;;  %v6984_v44 = vsub.f32 %v1639_v4, %v6979_v46  ;;  %v1640_v0 = vmax.f32 %v5018_v47, 0.0  ;;  %4286 = vmatmul.mubr.f32.gmra.mrb[24].mxu1 %v1865_v22  ;;  %v1874_v48 = vsub.f32 %v6972_v39, %v7647_v62 }
 0x2d2   : > { %v1621_v30 = vpop.f32.mrb[32].mxu0  ;;  %4288 = vmatprep.mubr.msk.f32.mxu1 %vm5618_vm0, %v7665_v34 }
 0x2d3   : > { %v6991_v61 = vand.u32 4294901760, %v1640_v0  ;;  %v5019_v27 = vadd.f32 %v6784_v5, %v1621_v30  ;;  %v4216_v12 = vpop.f32.mrb[33].mxu0  ;;  %v1875_v21 = vand.u32 4294901760, %v1874_v48  ;;  %v7652_v32 = vand.u32 4294901760, %v6984_v44 }
 0x2d5   : > { %7730 = vst [vmem:[#allocation15_spill] sm:$0xff] %v6991_v61  ;;  %v6996_v4 = vsub.f32 %v1640_v0, %v6991_v61  ;;  %v1641_v47 = vmax.f32 %v5019_v27, 0.0  ;;  %4289 = vmatmul.mubr.f32.gmra.mrb[26].mxu1 %v1875_v21  ;;  %v1884_v22 = vsub.f32 %v6984_v44, %v7652_v32  ;;  %v7746_v32 = vand.u32 4294901760, %v6793_v20 }
 0x2d6   : > { %4291 = vmatprep.mubr.msk.f32.mxu1 %vm5618_vm0, %v7665_v34 }
 0x2d7   : > { %v7003_v62 = vand.u32 4294901760, %v1641_v47  ;;  %v1885_v39 = vand.u32 4294901760, %v1884_v22  ;;  %v7651_v5 = vand.u32 4294901760, %v6996_v4  ;;  %v7734_v22 = vpack.c.bf16 %v6534_v52, %v6529_v11 }
 0x2d9   : > { %7731 = vst [vmem:[#allocation16_spill] sm:$0xff] %v7003_v62  ;;  %v7007_v30 = vsub.f32 %v1641_v47, %v7003_v62  ;;  %4292 = vmatmul.mubr.f32.gmra.mrb[28].mxu1 %v1885_v39  ;;  %v1894_v0 = vsub.f32 %v6996_v4, %v7651_v5  ;;  %v7732_v39 = vpack.c.bf16 %v6522_v58, %v6520_v45 }
 0x2da   : > { %4294 = vmatprep.mubr.msk.f32.mxu1 %vm5618_vm0, %v7665_v34  ;;  %v7733_v47 = vpack.c.bf16 %v6527_v60, %v6524_v50 }
 0x2db   : > { %v1895_v48 = vand.u32 4294901760, %v1894_v0  ;;  %v7650_v27 = vand.u32 4294901760, %v7007_v30  ;;  %v7735_v0 = vpack.c.bf16 %v6543_v26, %v6541_v63 }
 0x2dd   : > { %4295 = vmatmul.mubr.f32.gmra.mrb[30].mxu1 %v1895_v48  ;;  %v1904_v12 = vsub.f32 %v7007_v30, %v7650_v27  ;;  %v7736_v48 = vpack.c.bf16 %v6685_v7, %v6683_v24  ;;  %v7745_v27 = vand.u32 4294901760, %v6522_v58  ;;  %v7751_v58 = vand.u32 4294901760, %v6534_v52 }
 0x2de   : > { %4297 = vmatprep.mubr.msk.f32.mxu1 %vm5618_vm0, %v7665_v34  ;;  %v7756_v52 = vand.u32 4294901760, %v6683_v24  ;;  %v7761_v24 = vand.u32 4294901760, %v6854_v57 }
 0x2df   : > { %v1905_v21 = vand.u32 4294901760, %v1904_v12  ;;  %v7737_v12 = vpack.c.bf16 %v6699_v8, %v6697_v10 }
 0x2e1   : > { %4298 = vmatmul.mubr.f32.gmra.mrb[32].mxu1 %v1905_v21  ;;  %v4926_v21 = vpack.c.bf16 %v6705_v37, %v6703_v17 }
 0x2e2   : > { %4332 = vmatprep.mubr.msk.f32.mxu1 %vm5618_vm0, %v7665_v34 }
 0x2e5   : > { %4333 = vmatmul.mubr.f32.vlgmr.msra.gmra.mrb[0].mxu1 %v6789_v25 }
 0x2e6   : > { %4909 = vmatpush3.bf16.msra.mxu1 %v7732_v39  ;;  %4335 = vmatprep.mubr.msk.f32.mxu1 %vm5618_vm0, %v7665_v34  ;;  %v4929_v39 = vpack.c.bf16 %v6709_v43, %v6707_v41 }
 0x2e7   : > { %4910 = vmatprep.subr.bf16.mxu1 %v7673_v9 }
 0x2e9   : > { %4336 = vmatmul.mubr.f32.gmra.mrb[2].mxu1 %v6795_v49 }
 0x2ea   : > { %4338 = vmatprep.mubr.msk.f32.mxu1 %vm5618_vm0, %v7665_v34  ;;  %4912 = vmatpush3.bf16.msra.mxu1 %v7733_v47  ;;  %v7738_v47 = vld [vmem:[#allocation7_spill] sm:$0xff] }
 0x2eb   : > { %4913 = vmatprep.subr.bf16.mxu1 %v7673_v9 }
 0x2ed   : > { %4339 = vmatmul.mubr.f32.gmra.mrb[4].mxu1 %v6805_v59 }
 0x2ee   : > { %4341 = vmatprep.mubr.msk.f32.mxu1 %vm5618_vm0, %v7665_v34  ;;  %4915 = vmatpush3.bf16.msra.mxu1 %v7734_v22  ;;  %v7739_v22 = vld [vmem:[#allocation8_spill] sm:$0xff] }
 0x2ef   : > { %4916 = vmatprep.subr.bf16.mxu1 %v7673_v9 }
 0x2f1   : > { %4342 = vmatmul.mubr.f32.gmra.mrb[6].mxu1 %v6818_v55 }
 0x2f2   : > { %4344 = vmatprep.mubr.msk.f32.mxu1 %vm5618_vm0, %v7665_v34  ;;  %4918 = vmatpush3.bf16.msra.mxu1 %v7735_v0  ;;  %v7740_v0 = vld [vmem:[#allocation9_spill] sm:$0xff] }
 0x2f3   : > { %4919 = vmatprep.subr.bf16.mxu1 %v7673_v9 }
 0x2f5   : > { %4345 = vmatmul.mubr.f32.gmra.mrb[8].mxu1 %v6832_v28 }
 0x2f6   : > { %4347 = vmatprep.mubr.msk.f32.mxu1 %vm5618_vm0, %v7665_v34  ;;  %4921 = vmatpush3.bf16.msra.mxu1 %v7736_v48  ;;  %v7741_v48 = vld [vmem:[#allocation11_spill] sm:$0xff] }
 0x2f7   : > { %4922 = vmatprep.subr.bf16.mxu1 %v7673_v9 }
 0x2f9   : > { %4348 = vmatmul.mubr.f32.gmra.mrb[10].mxu1 %v6848_v3 }
 0x2fa   : > { %4350 = vmatprep.mubr.msk.f32.mxu1 %vm5618_vm0, %v7665_v34  ;;  %4924 = vmatpush3.bf16.msra.mxu1 %v7737_v12  ;;  %v7742_v12 = vld [vmem:[#allocation10_spill] sm:$0xff] }
 0x2fb   : > { %4925 = vmatprep.subr.bf16.mxu1 %v7673_v9 }
 0x2fd   : > { %4351 = vmatmul.mubr.f32.gmra.mrb[12].mxu1 %v6870_v53 }
 0x2fe   : > { %4353 = vmatprep.mubr.msk.f32.mxu1 %vm5618_vm0, %v7665_v34  ;;  %4927 = vmatpush3.bf16.msra.mxu1 %v4926_v21  ;;  %v7743_v21 = vld [vmem:[#allocation13_spill] sm:$0xff] }
 0x2ff   : > { %4928 = vmatprep.subr.bf16.mxu1 %v7673_v9 }
 0x301   : > { %4354 = vmatmul.mubr.f32.gmra.mrb[14].mxu1 %v6890_v40 }
 0x302   : > { %4356 = vmatprep.mubr.msk.f32.mxu1 %vm5618_vm0, %v7665_v34  ;;  %4930 = vmatpush3.bf16.msra.mxu1 %v4929_v39  ;;  %v7744_v39 = vand.u32 4294901760, %v6520_v45  ;;  %v7750_v45 = vand.u32 4294901760, %v6529_v11  ;;  %v7755_v11 = vand.u32 4294901760, %v6824_v51 }
 0x303   : > { %4931 = vmatprep.subr.bf16.mxu1 %v7673_v9 }
 0x304   : > { %v4956_v5 = vpack.c.bf16 %v7745_v27, %v7744_v39  ;;  %v7774_v27 = vand.u32 4294901760, %v6984_v44 }
 0x305   : > { %4357 = vmatmul.mubr.f32.gmra.mrb[16].mxu1 %v6904_v13 }
 0x306   : > { %4359 = vmatprep.mubr.msk.f32.mxu1 %vm5618_vm0, %v7665_v34 }
 0x309   : > { %4360 = vmatmul.mubr.f32.gmra.mrb[18].mxu1 %v6917_v56 }
 0x30a   : > { %4362 = vmatprep.mubr.msk.f32.mxu1 %vm5618_vm0, %v7665_v34 }
 0x30d   : > { %4363 = vmatmul.mubr.f32.gmra.mrb[20].mxu1 %v6930_v14 }
 0x30e   : > { %4365 = vmatprep.mubr.msk.f32.mxu1 %vm5618_vm0, %v7665_v34 }
 0x311   : > { %4366 = vmatmul.mubr.f32.gmra.mrb[22].mxu1 %v6943_v15 }
 0x312   : > { %4368 = vmatprep.mubr.msk.f32.mxu1 %vm5618_vm0, %v7665_v34 }
 0x315   : > { %4369 = vmatmul.mubr.f32.gmra.mrb[24].mxu1 %v6955_v29 }
 0x316   : > { %4371 = vmatprep.mubr.msk.f32.mxu1 %vm5618_vm0, %v7665_v34 }
 0x319   : > { %4372 = vmatmul.mubr.f32.gmra.mrb[26].mxu1 %v6967_v54  ;;  %v7749_v54 = vand.u32 4294901760, %v6800_v31 }
 0x31a   : > { %4374 = vmatprep.mubr.msk.f32.mxu1 %vm5618_vm0, %v7665_v34 }
 0x31d   : > { %4375 = vmatmul.mubr.f32.gmra.mrb[28].mxu1 %v6979_v46 }
 0x31e   : > { %4377 = vmatprep.mubr.msk.f32.mxu1 %vm5618_vm0, %v7665_v34 }
 0x321   : > { %4378 = vmatmul.mubr.f32.gmra.mrb[30].mxu1 %v6991_v61  ;;  %v7748_v61 = vand.u32 4294901760, %v6527_v60  ;;  %v7753_v60 = vand.u32 4294901760, %v6541_v63  ;;  %v7758_v63 = vand.u32 4294901760, %v6838_v1 }
 0x322   : > { %4380 = vmatprep.mubr.msk.f32.mxu1 %vm5618_vm0, %v7665_v34 }
 0x325   : > { %4381 = vmatmul.mubr.f32.gmra.mrb[32].mxu1 %v7003_v62  ;;  %v7747_v62 = vand.u32 4294901760, %v6524_v50  ;;  %v7752_v50 = vand.u32 4294901760, %v6810_v38 }
 0x326   : > { %4415 = vmatprep.mubr.msk.f32.mxu1 %vm5618_vm0, %v7665_v34 }
 0x327   : > { %v4959_v46 = vpack.c.bf16 %v7748_v61, %v7747_v62 }
 0x329   : > { %4416 = vmatmul.mubr.f32.vlgmr.msra.gmra.mrb[0].mxu1 %v6793_v20 }
 0x32a   : > { %4933 = vmatpush3.bf16.msra.mxu1 %v6518_v42  ;;  %4418 = vmatprep.mubr.msk.f32.mxu1 %vm5618_vm0, %v7665_v34 }
 0x32b   : > { %4934 = vmatprep.subr.bf16.mxu1 %v7673_v9 }
 0x32d   : > { %4419 = vmatmul.mubr.f32.gmra.mrb[2].mxu1 %v6800_v31  ;;  %v7757_v31 = vand.u32 4294901760, %v6685_v7  ;;  %v7762_v7 = vand.u32 4294901760, %v6703_v17  ;;  %v7767_v17 = vand.u32 4294901760, %v6896_v33 }
 0x32e   : > { %4421 = vmatprep.mubr.msk.f32.mxu1 %vm5618_vm0, %v7665_v34  ;;  %4936 = vmatpush3.bf16.msra.mxu1 %v6538_v19 }
 0x32f   : > { %4937 = vmatprep.subr.bf16.mxu1 %v7673_v9 }
 0x331   : > { %4422 = vmatmul.mubr.f32.gmra.mrb[4].mxu1 %v6810_v38  ;;  %v4968_v38 = vpack.c.bf16 %v7757_v31, %v7756_v52 }
 0x332   : > { %4424 = vmatprep.mubr.msk.f32.mxu1 %vm5618_vm0, %v7665_v34  ;;  %4939 = vmatpush3.bf16.msra.mxu1 %v6551_v18 }
 0x333   : > { %4940 = vmatprep.subr.bf16.mxu1 %v7673_v9 }
 0x335   : > { %4425 = vmatmul.mubr.f32.gmra.mrb[6].mxu1 %v6824_v51  ;;  %v7760_v51 = vand.u32 4294901760, %v6699_v8  ;;  %v7765_v8 = vand.u32 4294901760, %v6707_v41  ;;  %v7769_v41 = vand.u32 4294901760, %v7739_v22 }
 0x336   : > { %4427 = vmatprep.mubr.msk.f32.mxu1 %vm5618_vm0, %v7665_v34  ;;  %4942 = vmatpush3.bf16.msra.mxu1 %v6560_v23 }
 0x337   : > { %4943 = vmatprep.subr.bf16.mxu1 %v7673_v9 }
 0x339   : > { %4428 = vmatmul.mubr.f32.gmra.mrb[8].mxu1 %v6838_v1  ;;  %v7763_v1 = vand.u32 4294901760, %v6705_v37  ;;  %v7768_v37 = vand.u32 4294901760, %v7738_v47 }
 0x33a   : > { %4430 = vmatprep.mubr.msk.f32.mxu1 %vm5618_vm0, %v7665_v34  ;;  %4945 = vmatpush3.bf16.msra.mxu1 %v6661_v2 }
 0x33b   : > { %4946 = vmatprep.subr.bf16.mxu1 %v7673_v9 }
 0x33d   : > { %4431 = vmatmul.mubr.f32.gmra.mrb[10].mxu1 %v6854_v57  ;;  %v7766_v57 = vand.u32 4294901760, %v6709_v43  ;;  %v7770_v43 = vand.u32 4294901760, %v7740_v0 }
 0x33e   : > { %4433 = vmatprep.mubr.msk.f32.mxu1 %vm5618_vm0, %v7665_v34  ;;  %4948 = vmatpush3.bf16.msra.mxu1 %v6671_v36 }
 0x33f   : > { %4949 = vmatprep.subr.bf16.mxu1 %v7673_v9  ;;  %v4977_v61 = vpack.c.bf16 %v7766_v57, %v7765_v8 }
 0x341   : > { %4434 = vmatmul.mubr.f32.gmra.mrb[12].mxu1 %v6876_v6 }
 0x342   : > { %4436 = vmatprep.mubr.msk.f32.mxu1 %vm5618_vm0, %v7665_v34  ;;  %4951 = vmatpush3.bf16.msra.mxu1 %v6681_v35 }
 0x343   : > { %4952 = vmatprep.subr.bf16.mxu1 %v7673_v9 }
 0x345   : > { %4437 = vmatmul.mubr.f32.gmra.mrb[14].mxu1 %v6896_v33  ;;  %v7772_v33 = vand.u32 4294901760, %v7742_v12 }
 0x346   : > { %4439 = vmatprep.mubr.msk.f32.mxu1 %vm5618_vm0, %v7665_v34  ;;  %4954 = vmatpush3.bf16.msra.mxu1 %v6695_v16 }
 0x347   : > { %4955 = vmatprep.subr.bf16.mxu1 %v7673_v9 }
 0x349   : > { %4440 = vmatmul.mubr.f32.gmra.mrb[16].mxu1 %v7738_v47  ;;  %v7775_v47 = vand.u32 4294901760, %v6996_v4 }
 0x34a   : > { %4442 = vmatprep.mubr.msk.f32.mxu1 %vm5618_vm0, %v7665_v34 }
 0x34d   : > { %4443 = vmatmul.mubr.f32.gmra.mrb[18].mxu1 %v7739_v22  ;;  %v7776_v22 = vand.u32 4294901760, %v7007_v30 }
 0x34e   : > { %4445 = vmatprep.mubr.msk.f32.mxu1 %vm5618_vm0, %v7665_v34 }
 0x351   : > { %4446 = vmatmul.mubr.f32.gmra.mrb[20].mxu1 %v7740_v0 }
 0x352   : > { %4448 = vmatprep.mubr.msk.f32.mxu1 %vm5618_vm0, %v7665_v34 }
 0x355   : > { %4449 = vmatmul.mubr.f32.gmra.mrb[22].mxu1 %v7741_v48 }
 0x356   : > { %4451 = vmatprep.mubr.msk.f32.mxu1 %vm5618_vm0, %v7665_v34 }
 0x359   : > { %4452 = vmatmul.mubr.f32.gmra.mrb[24].mxu1 %v7742_v12 }
 0x35a   : > { %4454 = vmatprep.mubr.msk.f32.mxu1 %vm5618_vm0, %v7665_v34 }
 0x35d   : > { %4455 = vmatmul.mubr.f32.gmra.mrb[26].mxu1 %v7743_v21 }
 0x35e   : > { %4457 = vmatprep.mubr.msk.f32.mxu1 %vm5618_vm0, %v7665_v34 }
 0x361   : > { %4458 = vmatmul.mubr.f32.gmra.mrb[28].mxu1 %v6984_v44 }
 0x362   : > { %4460 = vmatprep.mubr.msk.f32.mxu1 %vm5618_vm0, %v7665_v34 }
 0x365   : > { %4461 = vmatmul.mubr.f32.gmra.mrb[30].mxu1 %v6996_v4 }
 0x366   : > { %4463 = vmatprep.mubr.msk.f32.mxu1 %vm5618_vm0, %v7665_v34 }
 0x369   : > { %4464 = vmatmul.mubr.f32.gmra.mrb[32].mxu1 %v7007_v30 }
 0x36a   : > { %4498 = vmatprep.mubr.msk.f32.mxu1 %vm5618_vm0, %v7665_v34 }
 0x36d   : > { %4499 = vmatmul.mubr.f32.vlgmr.msra.gmra.mrb[0].mxu1 %v7746_v32  ;;  %v4962_v32 = vpack.c.bf16 %v7751_v58, %v7750_v45 }
 0x36e   : > { %4957 = vmatpush3.bf16.msra.mxu1 %v4956_v5  ;;  %4501 = vmatprep.mubr.msk.f32.mxu1 %vm5618_vm0, %v7665_v34  ;;  %v7773_v5 = vand.u32 4294901760, %v7743_v21 }
 0x36f   : > { %4958 = vmatprep.subr.bf16.mxu1 %v7673_v9 }
 0x371   : > { %4502 = vmatmul.mubr.f32.gmra.mrb[2].mxu1 %v7749_v54  ;;  %v7754_v54 = vand.u32 4294901760, %v6543_v26  ;;  %v7759_v26 = vand.u32 4294901760, %v6697_v10  ;;  %v7764_v10 = vand.u32 4294901760, %v6876_v6  ;;  %v7771_v6 = vand.u32 4294901760, %v7741_v48 }
 0x372   : > { %4504 = vmatprep.mubr.msk.f32.mxu1 %vm5618_vm0, %v7665_v34  ;;  %4960 = vmatpush3.bf16.msra.mxu1 %v4959_v46  ;;  %v4974_v46 = vpack.c.bf16 %v7763_v1, %v7762_v7 }
 0x373   : > { %4961 = vmatprep.subr.bf16.mxu1 %v7673_v9  ;;  %v4965_v20 = vpack.c.bf16 %v7754_v54, %v7753_v60  ;;  %v4971_v62 = vpack.c.bf16 %v7760_v51, %v7759_v26 }
 0x375   : > { %4505 = vmatmul.mubr.f32.gmra.mrb[4].mxu1 %v7752_v50 }
 0x376   : > { %4507 = vmatprep.mubr.msk.f32.mxu1 %vm5618_vm0, %v7665_v34  ;;  %4963 = vmatpush3.bf16.msra.mxu1 %v4962_v32 }
 0x377   : > { %4964 = vmatprep.subr.bf16.mxu1 %v7673_v9 }
 0x379   : > { %4508 = vmatmul.mubr.f32.gmra.mrb[6].mxu1 %v7755_v11 }
 0x37a   : > { %4510 = vmatprep.mubr.msk.f32.mxu1 %vm5618_vm0, %v7665_v34  ;;  %4966 = vmatpush3.bf16.msra.mxu1 %v4965_v20 }
 0x37b   : > { %4967 = vmatprep.subr.bf16.mxu1 %v7673_v9 }
 0x37d   : > { %4511 = vmatmul.mubr.f32.gmra.mrb[8].mxu1 %v7758_v63 }
 0x37e   : > { %4513 = vmatprep.mubr.msk.f32.mxu1 %vm5618_vm0, %v7665_v34  ;;  %4969 = vmatpush3.bf16.msra.mxu1 %v4968_v38 }
 0x37f   : > { %4970 = vmatprep.subr.bf16.mxu1 %v7673_v9 }
 0x381   : > { %4514 = vmatmul.mubr.f32.gmra.mrb[10].mxu1 %v7761_v24 }
 0x382   : > { %4516 = vmatprep.mubr.msk.f32.mxu1 %vm5618_vm0, %v7665_v34  ;;  %4972 = vmatpush3.bf16.msra.mxu1 %v4971_v62 }
 0x383   : > { %4973 = vmatprep.subr.bf16.mxu1 %v7673_v9 }
 0x385   : > { %4517 = vmatmul.mubr.f32.gmra.mrb[12].mxu1 %v7764_v10 }
 0x386   : > { %4519 = vmatprep.mubr.msk.f32.mxu1 %vm5618_vm0, %v7665_v34  ;;  %4975 = vmatpush3.bf16.msra.mxu1 %v4974_v46 }
 0x387   : > { %4976 = vmatprep.subr.bf16.mxu1 %v7673_v9 }
 0x389   : > { %4520 = vmatmul.mubr.f32.gmra.mrb[14].mxu1 %v7767_v17 }
 0x38a   : > { %4522 = vmatprep.mubr.msk.f32.mxu1 %vm5618_vm0, %v7665_v34  ;;  %4978 = vmatpush3.bf16.msra.mxu1 %v4977_v61 }
 0x38b   : > { %4979 = vmatprep.subr.bf16.mxu1 %v7673_v9 }
 0x38d   : > { %4523 = vmatmul.mubr.f32.gmra.mrb[16].mxu1 %v7768_v37 }
 0x38e   : > { %4525 = vmatprep.mubr.msk.f32.mxu1 %vm5618_vm0, %v7665_v34 }
 0x391   : > { %4526 = vmatmul.mubr.f32.gmra.mrb[18].mxu1 %v7769_v41 }
 0x392   : > { %4528 = vmatprep.mubr.msk.f32.mxu1 %vm5618_vm0, %v7665_v34 }
 0x395   : > { %4529 = vmatmul.mubr.f32.gmra.mrb[20].mxu1 %v7770_v43 }
 0x396   : > { %4531 = vmatprep.mubr.msk.f32.mxu1 %vm5618_vm0, %v7665_v34 }
 0x399   : > { %4532 = vmatmul.mubr.f32.gmra.mrb[22].mxu1 %v7771_v6 }
 0x39a   : > { %4534 = vmatprep.mubr.msk.f32.mxu1 %vm5618_vm0, %v7665_v34 }
 0x39d   : > { %4535 = vmatmul.mubr.f32.gmra.mrb[24].mxu1 %v7772_v33 }
 0x39e   : > { %4537 = vmatprep.mubr.msk.f32.mxu1 %vm5618_vm0, %v7665_v34 }
 0x3a1   : > { %4538 = vmatmul.mubr.f32.gmra.mrb[26].mxu1 %v7773_v5 }
 0x3a2   : > { %4540 = vmatprep.mubr.msk.f32.mxu1 %vm5618_vm0, %v7665_v34 }
 0x3a5   : > { %4541 = vmatmul.mubr.f32.gmra.mrb[28].mxu1 %v7774_v27 }
 0x3a6   : > { %4543 = vmatprep.mubr.msk.f32.mxu1 %vm5618_vm0, %v7665_v34 }
 0x3a9   : > { %4544 = vmatmul.mubr.f32.gmra.mrb[30].mxu1 %v7775_v47 }
 0x3aa   : > { %4546 = vmatprep.mubr.msk.f32.mxu1 %vm5618_vm0, %v7665_v34 }
 0x3ad   : > { %4547 = vmatmul.mubr.f32.gmra.mrb[32].mxu1 %v7776_v22 }
 0x3ae   : > { %4581 = vmatprep.mubr.msk.f32.mxu1 %vm5618_vm0, %v7665_v34 }
 0x3b1   : > { %4582 = vmatmul.mubr.f32.vlgmr.msra.gmra.mrb[0].mxu1 %v6789_v25 }
 0x3b2   : > { %4981 = vmatpush3.bf16.msra.mxu1 %v6518_v42  ;;  %4584 = vmatprep.mubr.msk.f32.mxu1 %vm5618_vm0, %v7665_v34  ;;  %v7778_v42 = vld [vmem:[#allocation14_spill] sm:$0xff] }
 0x3b3   : > { %4982 = vmatprep.subr.bf16.mxu1 %v7673_v9 }
 0x3b5   : > { %4585 = vmatmul.mubr.f32.gmra.mrb[2].mxu1 %v6795_v49 }
 0x3b6   : > { %4587 = vmatprep.mubr.msk.f32.mxu1 %vm5618_vm0, %v7665_v34  ;;  %4984 = vmatpush3.bf16.msra.mxu1 %v6538_v19  ;;  %v7779_v19 = vld [vmem:[#allocation15_spill] sm:$0xff] }
 0x3b7   : > { %4985 = vmatprep.subr.bf16.mxu1 %v7673_v9 }
 0x3b9   : > { %4588 = vmatmul.mubr.f32.gmra.mrb[4].mxu1 %v6805_v59 }
 0x3ba   : > { %4590 = vmatprep.mubr.msk.f32.mxu1 %vm5618_vm0, %v7665_v34  ;;  %4987 = vmatpush3.bf16.msra.mxu1 %v6551_v18  ;;  %v7780_v18 = vld [vmem:[#allocation16_spill] sm:$0xff] }
 0x3bb   : > { %4988 = vmatprep.subr.bf16.mxu1 %v7673_v9 }
 0x3bd   : > { %4591 = vmatmul.mubr.f32.gmra.mrb[6].mxu1 %v6818_v55 }
 0x3be   : > { %4593 = vmatprep.mubr.msk.f32.mxu1 %vm5618_vm0, %v7665_v34  ;;  %4990 = vmatpush3.bf16.msra.mxu1 %v6560_v23  ;;  %v7393_v23 = vstv %s1658_s6 }
 0x3bf   : > { %4991 = vmatprep.subr.bf16.mxu1 %v7673_v9 }
 0x3c1   : > { %4594 = vmatmul.mubr.f32.gmra.mrb[8].mxu1 %v6832_v28 }
 0x3c2   : > { %4596 = vmatprep.mubr.msk.f32.mxu1 %vm5618_vm0, %v7665_v34  ;;  %4993 = vmatpush3.bf16.msra.mxu1 %v6661_v2 }
 0x3c3   : > { %4994 = vmatprep.subr.bf16.mxu1 %v7673_v9 }
 0x3c5   : > { %4597 = vmatmul.mubr.f32.gmra.mrb[10].mxu1 %v6848_v3 }
 0x3c6   : > { %4599 = vmatprep.mubr.msk.f32.mxu1 %vm5618_vm0, %v7665_v34  ;;  %4996 = vmatpush3.bf16.msra.mxu1 %v6671_v36 }
 0x3c7   : > { %4997 = vmatprep.subr.bf16.mxu1 %v7673_v9 }
 0x3c9   : > { %4600 = vmatmul.mubr.f32.gmra.mrb[12].mxu1 %v6870_v53 }
 0x3ca   : > { %4602 = vmatprep.mubr.msk.f32.mxu1 %vm5618_vm0, %v7665_v34  ;;  %4999 = vmatpush3.bf16.msra.mxu1 %v6681_v35 }
 0x3cb   : > { %5000 = vmatprep.subr.bf16.mxu1 %v7673_v9  ;;  %v7777_v9 = vld [vmem:[#allocation12_spill] sm:$0xff] }
 0x3cd   : > { %4603 = vmatmul.mubr.f32.gmra.mrb[14].mxu1 %v6890_v40 }
 0x3ce   : > { %4605 = vmatprep.mubr.msk.f32.mxu1 %vm5618_vm0, %v7665_v34  ;;  %5002 = vmatpush3.bf16.msra.mxu1 %v6695_v16 }
 0x3d1   : > { %4606 = vmatmul.mubr.f32.gmra.mrb[16].mxu1 %v6904_v13 }
 0x3d2   : > { %4608 = vmatprep.mubr.msk.f32.mxu1 %vm5618_vm0, %v7665_v34 }
 0x3d5   : > { %4609 = vmatmul.mubr.f32.gmra.mrb[18].mxu1 %v6917_v56 }
 0x3d6   : > { %4611 = vmatprep.mubr.msk.f32.mxu1 %vm5618_vm0, %v7665_v34 }
 0x3d9   : > { %4612 = vmatmul.mubr.f32.gmra.mrb[20].mxu1 %v6930_v14 }
 0x3da   : > { %4614 = vmatprep.mubr.msk.f32.mxu1 %vm5618_vm0, %v7665_v34 }
 0x3dd   : > { %4615 = vmatmul.mubr.f32.gmra.mrb[22].mxu1 %v6943_v15 }
 0x3de   : > { %4617 = vmatprep.mubr.msk.f32.mxu1 %vm5618_vm0, %v7665_v34 }
 0x3e1   : > { %4618 = vmatmul.mubr.f32.gmra.mrb[24].mxu1 %v6955_v29 }
 0x3e2   : > { %4620 = vmatprep.mubr.msk.f32.mxu1 %vm5618_vm0, %v7665_v34 }
 0x3e5   : > { %4621 = vmatmul.mubr.f32.gmra.mrb[26].mxu1 %v7777_v9 }
 0x3e6   : > { %4623 = vmatprep.mubr.msk.f32.mxu1 %vm5618_vm0, %v7665_v34 }
 0x3e9   : > { %4624 = vmatmul.mubr.f32.gmra.mrb[28].mxu1 %v7778_v42 }
 0x3ea   : > { %4626 = vmatprep.mubr.msk.f32.mxu1 %vm5618_vm0, %v7665_v34 }
 0x3ed   : > { %4627 = vmatmul.mubr.f32.gmra.mrb[30].mxu1 %v7779_v19 }
 0x3ee   : > { %4629 = vmatprep.mubr.msk.f32.mxu1 %vm5618_vm0, %v7665_v34 }
 0x3f1   : > { %4630 = vmatmul.mubr.f32.gmra.mrb[32].mxu1 %v7780_v18 }
 0x3f2   : > { %4664 = vmatprep.mubr.msk.f32.mxu1 %vm5618_vm0, %v7665_v34 }
 0x3f5   : > { %4665 = vmatmul.mubr.f32.vlgmr.msra.gmra.mrb[0].mxu1 %v6789_v25 }
 0x3f6   : > { %4667 = vmatprep.mubr.msk.f32.mxu1 %vm5618_vm0, %v7665_v34 }
 0x3f9   : > { %4668 = vmatmul.mubr.f32.gmra.mrb[2].mxu1 %v6795_v49 }
 0x3fa   : > { %4670 = vmatprep.mubr.msk.f32.mxu1 %vm5618_vm0, %v7665_v34 }
 0x3fd   : > { %4671 = vmatmul.mubr.f32.gmra.mrb[4].mxu1 %v6805_v59 }
 0x3fe   : > { %4673 = vmatprep.mubr.msk.f32.mxu1 %vm5618_vm0, %v7665_v34 }
 0x401   : > { %4674 = vmatmul.mubr.f32.gmra.mrb[6].mxu1 %v6818_v55 }
 0x402   : > { %4676 = vmatprep.mubr.msk.f32.mxu1 %vm5618_vm0, %v7665_v34 }
 0x405   : > { %4677 = vmatmul.mubr.f32.gmra.mrb[8].mxu1 %v6832_v28 }
 0x406   : > { %4679 = vmatprep.mubr.msk.f32.mxu1 %vm5618_vm0, %v7665_v34 }
 0x409   : > { %4680 = vmatmul.mubr.f32.gmra.mrb[10].mxu1 %v6848_v3 }
 0x40a   : > { %4682 = vmatprep.mubr.msk.f32.mxu1 %vm5618_vm0, %v7665_v34 }
 0x40d   : > { %4683 = vmatmul.mubr.f32.gmra.mrb[12].mxu1 %v6870_v53 }
 0x40e   : > { %4685 = vmatprep.mubr.msk.f32.mxu1 %vm5618_vm0, %v7665_v34 }
 0x411   : > { %4686 = vmatmul.mubr.f32.gmra.mrb[14].mxu1 %v6890_v40 }
 0x412   : > { %4688 = vmatprep.mubr.msk.f32.mxu1 %vm5618_vm0, %v7665_v34 }
 0x415   : > { %4689 = vmatmul.mubr.f32.gmra.mrb[16].mxu1 %v6904_v13 }
 0x416   : > { %4691 = vmatprep.mubr.msk.f32.mxu1 %vm5618_vm0, %v7665_v34 }
 0x419   : > { %4692 = vmatmul.mubr.f32.gmra.mrb[18].mxu1 %v6917_v56 }
 0x41a   : > { %4694 = vmatprep.mubr.msk.f32.mxu1 %vm5618_vm0, %v7665_v34 }
 0x41d   : > { %4695 = vmatmul.mubr.f32.gmra.mrb[20].mxu1 %v6930_v14 }
 0x41e   : > { %4697 = vmatprep.mubr.msk.f32.mxu1 %vm5618_vm0, %v7665_v34 }
 0x421   : > { %4698 = vmatmul.mubr.f32.gmra.mrb[22].mxu1 %v6943_v15 }
 0x422   : > { %4700 = vmatprep.mubr.msk.f32.mxu1 %vm5618_vm0, %v7665_v34 }
 0x425   : > { %4701 = vmatmul.mubr.f32.gmra.mrb[24].mxu1 %v6955_v29 }
 0x426   : > { %4703 = vmatprep.mubr.msk.f32.mxu1 %vm5618_vm0, %v7665_v34 }
 0x429   : > { %4704 = vmatmul.mubr.f32.gmra.mrb[26].mxu1 %v7777_v9 }
 0x42a   : > { %4706 = vmatprep.mubr.msk.f32.mxu1 %vm5618_vm0, %v7665_v34 }
 0x42d   : > { %4707 = vmatmul.mubr.f32.gmra.mrb[28].mxu1 %v7778_v42 }
 0x42e   : > { %4709 = vmatprep.mubr.msk.f32.mxu1 %vm5618_vm0, %v7665_v34 }
 0x431   : > { %4710 = vmatmul.mubr.f32.gmra.mrb[30].mxu1 %v7779_v19 }
 0x432   : > { %4712 = vmatprep.mubr.msk.f32.mxu1 %vm5618_vm0, %v7665_v34 }
 0x435   : > { %4713 = vmatmul.mubr.f32.gmra.mrb[32].mxu1 %v7780_v18 }
 0x4c8   : > { %v2889_v2 = vpop.f32.mrb[0].mxu1 }
 0x4c9   : > { %v5020_v36 = vadd.f32 %v2889_v2, %v7393_v23  ;;  %v4666_v35 = vpop.f32.mrb[1].mxu1 }
 0x4cb   : > { %2990 = vst.msk [vmem:[%s7397_s7] sm:$0xff] %vm2989_vm1, %v5020_v36 }
 0x4cc   : > { %v2895_v34 = vpop.f32.mrb[2].mxu1 }
 0x4cd   : > { %v5021_v16 = vadd.f32 %v2895_v34, %v7393_v23  ;;  %v4669_v29 = vpop.f32.mrb[3].mxu1 }
 0x4cf   : > { %2991 = vst.msk [vmem:[%s7397_s7 + $0x8] sm:$0xff] %vm2989_vm1, %v5021_v16 }
 0x4d0   : > { %v2901_v25 = vpop.f32.mrb[4].mxu1 }
 0x4d1   : > { %v5022_v49 = vadd.f32 %v2901_v25, %v7393_v23  ;;  %v4672_v59 = vpop.f32.mrb[5].mxu1 }
 0x4d3   : > { %2992 = vst.msk [vmem:[%s7397_s7 + $0x10] sm:$0xff] %vm2989_vm1, %v5022_v49 }
 0x4d4   : > { %v2907_v55 = vpop.f32.mrb[6].mxu1 }
 0x4d5   : > { %v5023_v28 = vadd.f32 %v2907_v55, %v7393_v23  ;;  %v4675_v3 = vpop.f32.mrb[7].mxu1 }
 0x4d7   : > { %2993 = vst.msk [vmem:[%s7397_s7 + $0x18] sm:$0xff] %vm2989_vm1, %v5023_v28 }
 0x4d8   : > { %v2913_v13 = vpop.f32.mrb[8].mxu1 }
 0x4d9   : > { %v5024_v53 = vadd.f32 %v2913_v13, %v7393_v23  ;;  %v4678_v40 = vpop.f32.mrb[9].mxu1 }
 0x4db   : > { %2994 = vst.msk [vmem:[%s7397_s7 + $0x20] sm:$0xff] %vm2989_vm1, %v5024_v53 }
 0x4dc   : > { %v2919_v56 = vpop.f32.mrb[10].mxu1 }
 0x4dd   : > { %v5025_v14 = vadd.f32 %v2919_v56, %v7393_v23  ;;  %v4681_v15 = vpop.f32.mrb[11].mxu1 }
 0x4df   : > { %2995 = vst.msk [vmem:[%s7397_s7 + $0x28] sm:$0xff] %vm2989_vm1, %v5025_v14 }
 0x4e0   : > { %v2925_v44 = vpop.f32.mrb[12].mxu1 }
 0x4e1   : > { %v5026_v4 = vadd.f32 %v2925_v44, %v7393_v23  ;;  %v4684_v30 = vpop.f32.mrb[13].mxu1 }
 0x4e3   : > { %2996 = vst.msk [vmem:[%s7397_s7 + $0x30] sm:$0xff] %vm2989_vm1, %v5026_v4 }
 0x4e4   : > { %v2931_v0 = vpop.f32.mrb[14].mxu1 }
 0x4e5   : > { %v5027_v48 = vadd.f32 %v2931_v0, %v7393_v23  ;;  %v4687_v12 = vpop.f32.mrb[15].mxu1 }
 0x4e7   : > { %2997 = vst.msk [vmem:[%s7397_s7 + $0x38] sm:$0xff] %vm2989_vm1, %v5027_v48 }
 0x4e8   : > { %v2937_v21 = vpop.f32.mrb[16].mxu1 }
 0x4e9   : > { %v5028_v39 = vadd.f32 %v2937_v21, %v7393_v23  ;;  %v4690_v45 = vpop.f32.mrb[17].mxu1 }
 0x4eb   : > { %2998 = vst.msk [vmem:[%s7397_s7 + $0x40] sm:$0xff] %vm2989_vm1, %v5028_v39 }
 0x4ec   : > { %v2943_v58 = vpop.f32.mrb[18].mxu1 }
 0x4ed   : > { %v5029_v32 = vadd.f32 %v2943_v58, %v7393_v23  ;;  %v4693_v50 = vpop.f32.mrb[19].mxu1 }
 0x4ef   : > { %2999 = vst.msk [vmem:[%s7397_s7 + $0x48] sm:$0xff] %vm2989_vm1, %v5029_v32 }
 0x4f0   : > { %v2949_v60 = vpop.f32.mrb[20].mxu1 }
 0x4f1   : > { %v5030_v54 = vadd.f32 %v2949_v60, %v7393_v23  ;;  %v4696_v20 = vpop.f32.mrb[21].mxu1 }
 0x4f3   : > { %3000 = vst.msk [vmem:[%s7397_s7 + $0x50] sm:$0xff] %vm2989_vm1, %v5030_v54 }
 0x4f4   : > { %v2955_v11 = vpop.f32.mrb[22].mxu1 }
 0x4f5   : > { %v5031_v52 = vadd.f32 %v2955_v11, %v7393_v23  ;;  %v4699_v31 = vpop.f32.mrb[23].mxu1 }
 0x4f7   : > { %3001 = vst.msk [vmem:[%s7397_s7 + $0x58] sm:$0xff] %vm2989_vm1, %v5031_v52 }
 0x4f8   : > { %v2961_v38 = vpop.f32.mrb[24].mxu1 }
 0x4f9   : > { %v5032_v63 = vadd.f32 %v2961_v38, %v7393_v23  ;;  %v4702_v26 = vpop.f32.mrb[25].mxu1 }
 0x4fb   : > { %3002 = vst.msk [vmem:[%s7397_s7 + $0x60] sm:$0xff] %vm2989_vm1, %v5032_v63 }
 0x4fc   : > { %v2967_v51 = vpop.f32.mrb[26].mxu1 }
 0x4fd   : > { %v5033_v62 = vadd.f32 %v2967_v51, %v7393_v23  ;;  %v4705_v24 = vpop.f32.mrb[27].mxu1 }
 0x4ff   : > { %3003 = vst.msk [vmem:[%s7397_s7 + $0x68] sm:$0xff] %vm2989_vm1, %v5033_v62 }
 0x500   : > { %v2973_v7 = vpop.f32.mrb[28].mxu1 }
 0x501   : > { %v5034_v1 = vadd.f32 %v2973_v7, %v7393_v23  ;;  %v4708_v46 = vpop.f32.mrb[29].mxu1 }
 0x503   : > { %3004 = vst.msk [vmem:[%s7397_s7 + $0x70] sm:$0xff] %vm2989_vm1, %v5034_v1 }
 0x504   : > { %v2979_v10 = vpop.f32.mrb[30].mxu1 }
 0x505   : > { %v5035_v8 = vadd.f32 %v2979_v10, %v7393_v23  ;;  %v4711_v57 = vpop.f32.mrb[31].mxu1  ;;  %3013 = sbr.rel (!%p5693_p8) target bundleno = 1353 (0x549), region = 48 }
 0x507   : > { %3005 = vst.msk [vmem:[%s7397_s7 + $0x78] sm:$0xff] %vm2989_vm1, %v5035_v8 }
 0x508   : > { %v2985_v61 = vpop.f32.mrb[32].mxu1 }
 0x509   : > { %v5036_v17 = vadd.f32 %v2985_v61, %v7393_v23  ;;  %v4714_v37 = vpop.f32.mrb[33].mxu1 }
 0x50b   : > { %3006 = vst.msk [vmem:[%s7397_s7 + $0x80] sm:$0xff] %vm2989_vm1, %v5036_v17 }
 0x50c   : > { %s7791_s10 = smov (!%p3016_p7, %s3015_s10), 17 }
 0x50d   : > { %s3309_s15 = sshll.u32 %s7791_s10, 7 }
 0x50e   : > { %p3312_p11 = scmp.eq.s32.totalorder %s3309_s15, 0 }
 0x50f   : > { %5482 = sdivrem.u32 (!%p3312_p11), %s7791_s10, 17 }
 0x510   : > { %3024 = sbr.rel (%p3312_p11) target bundleno = 1353 (0x549), region = 52 }
 0x518   : > { %s7462_s29 = spop.drf %5482 }
 0x519   : > { %p3313_p8 = scmp.le.s32.totalorder %s7462_s29, 0 }
 0x51a   : > { %s7781_s4 = smov (!%p3313_p8), %s7456_s13  ;;  %s7782_s18 = smov (!%p3313_p8), %s7397_s7 }
 0x51b   : > { %3252 = sbr.rel (%p3313_p8) target bundleno = 1324 (0x52c), region = 134  ;;  %s7471_s23 = smov (!%p3313_p8), 0  }
 0x51c   : > { %s7473_s9 = smov (!%p3313_p8), 0  }
 0x522 LB: >> { %v3120_v41 = vld [vmem:[%s5588_s18] sm:$0xff]  ;;  %v3122_v43 = vld [vmem:[%s5588_s18 + $0x8] sm:$0xff]  ;;  %v3124_v6 = vld [vmem:[%s5588_s18 + $0x10] sm:$0xff]  ;;  %s3154_s11 = sadd.s32 1, %s5592_s23  ;;  %s3114_s9 = sadd.s32 1, %s5596_s9   ;;  %s5596_s9 = sphi %s7473_s9, %s3114_s9   ;;  %s5592_s23 = sphi %s7471_s23, %s7783_s23   ;;  %s5588_s18 = sphi %s7782_s18, %s3159_s18   ;;  %s5584_s4 = sphi %s7781_s4, %s3160_s4  }
 0x523   : >> { %3121 = vst [vmem:[%s5584_s4] sm:$0xff] %v3120_v41  ;;  %3123 = vst [vmem:[%s5584_s4 + $0x8] sm:$0xff] %v3122_v43  ;;  %v3126_v33 = vld [vmem:[%s5588_s18 + $0x18] sm:$0xff]  ;;  %v3128_v5 = vld [vmem:[%s5588_s18 + $0x20] sm:$0xff]  ;;  %p3155_p6 = scmp.ge.s32.totalorder %s3154_s11, %s7462_s29  ;;  %p3113_p9 = scmp.ge.s32.totalorder %s3114_s9, %s7462_s29 }
 0x524   : >> { %3125 = vst [vmem:[%s5584_s4 + $0x10] sm:$0xff] %v3124_v6  ;;  %v3130_v27 = vld [vmem:[%s5588_s18 + $0x28] sm:$0xff]  ;;  %3127 = vst [vmem:[%s5584_s4 + $0x18] sm:$0xff] %v3126_v33  ;;  %v3132_v47 = vld [vmem:[%s5588_s18 + $0x30] sm:$0xff] }
 0x525   : >> { %3129 = vst [vmem:[%s5584_s4 + $0x20] sm:$0xff] %v3128_v5  ;;  %3131 = vst [vmem:[%s5584_s4 + $0x28] sm:$0xff] %v3130_v27  ;;  %v3134_v22 = vld [vmem:[%s5588_s18 + $0x38] sm:$0xff]  ;;  %v3136_v9 = vld [vmem:[%s5588_s18 + $0x40] sm:$0xff]  ;;  %s7793_s11 = smov (%p3155_p6, %s3154_s11), 0  ;;  %3116 = sbr.rel (!%p3113_p9) target bundleno = 1314 (0x522), region = 140 }
 0x526   : >> { %3133 = vst [vmem:[%s5584_s4 + $0x30] sm:$0xff] %v3132_v47  ;;  %3135 = vst [vmem:[%s5584_s4 + $0x38] sm:$0xff] %v3134_v22  ;;  %v3138_v42 = vld [vmem:[%s5588_s18 + $0x48] sm:$0xff]  ;;  %v3140_v19 = vld [vmem:[%s5588_s18 + $0x50] sm:$0xff]  ;;  %s3157_s28 = smul.u32 136, %s7793_s11  ;;  %s7783_s23 = smov %s7793_s11 }
 0x527   : >> { %3137 = vst [vmem:[%s5584_s4 + $0x40] sm:$0xff] %v3136_v9  ;;  %v3142_v18 = vld [vmem:[%s5588_s18 + $0x58] sm:$0xff]  ;;  %3139 = vst [vmem:[%s5584_s4 + $0x48] sm:$0xff] %v3138_v42  ;;  %v3144_v23 = vld [vmem:[%s5588_s18 + $0x60] sm:$0xff] }
 0x528   : >> { %3141 = vst [vmem:[%s5584_s4 + $0x50] sm:$0xff] %v3140_v19  ;;  %3143 = vst [vmem:[%s5584_s4 + $0x58] sm:$0xff] %v3142_v18  ;;  %v3146_v2 = vld [vmem:[%s5588_s18 + $0x68] sm:$0xff]  ;;  %v3148_v36 = vld [vmem:[%s5588_s18 + $0x70] sm:$0xff] }
 0x529   : >> { %3145 = vst [vmem:[%s5584_s4 + $0x60] sm:$0xff] %v3144_v23  ;;  %3147 = vst [vmem:[%s5584_s4 + $0x68] sm:$0xff] %v3146_v2  ;;  %v3150_v35 = vld [vmem:[%s5588_s18 + $0x78] sm:$0xff]  ;;  %v3152_v34 = vld [vmem:[%s5588_s18 + $0x80] sm:$0xff]  ;;  %s3159_s18 = scalar_lea.vmem %s7397_s7, %s3157_s28 [#allocation5]  }
 0x52a   : >> { %3149 = vst [vmem:[%s5584_s4 + $0x70] sm:$0xff] %v3148_v36  ;;  %3151 = vst [vmem:[%s5584_s4 + $0x78] sm:$0xff] %v3150_v35 }
 0x52b   : >> { %3153 = vst [vmem:[%s5584_s4 + $0x80] sm:$0xff] %v3152_v34  ;;  %s3160_s4 = scalar_lea.vmem %s7456_s13, %s3157_s28  }
 0x52c PF: > { %5484 = sdivrem.u32 %s7791_s10, 17 }
 0x52d   : > { %s3314_s14 = smul.u32 136, %s7462_s29 }
 0x52f   : > { %s3165_s17 = scalar_lea.vmem %s7397_s7, %s3314_s14 [#allocation5]   ;;  %s3167_s20 = scalar_lea.vmem %s7456_s13, %s3314_s14  }
 0x535   : > { %s5485_s25 = spop.drf %5484 }
 0x536   : > { %p3316_p10 = scmp.le.s32.totalorder %s5485_s25, 0 }
 0x537   : > { %s5598_s26 = smov (!%p3316_p10), %s3167_s20   ;;  %s5602_s30 = smov (!%p3316_p10), %s3165_s17  }
 0x538   : > { %3266 = sbr.rel (%p3316_p10) target bundleno = 1353 (0x549), region = 145  ;;  %s5606_s6 = smov (!%p3316_p10), 0  }
 0x539   : > { %s5610_s16 = smov (!%p3316_p10), 0  }
 0x53f LB: >> { %v3177_v16 = vld [vmem:[%s5604_s30] sm:$0xff]  ;;  %s3179_s8 = sadd.s32 1, %s5608_s6  ;;  %s3171_s16 = sadd.s32 1, %s5612_s16   ;;  %s5612_s16 = sphi %s5610_s16, %s3171_s16   ;;  %s5608_s6 = sphi %s5606_s6, %s5607_s6   ;;  %s5604_s30 = sphi %s5602_s30, %s3184_s30   ;;  %s5600_s26 = sphi %s5598_s26, %s3185_s26  }
 0x540   : >> { %3178 = vst [vmem:[%s5600_s26] sm:$0xff] %v3177_v16  ;;  %p3180_p12 = scmp.ge.s32.totalorder %s3179_s8, %s5485_s25  ;;  %p3170_p13 = scmp.ge.s32.totalorder %s3171_s16, %s5485_s25 }
 0x542   : >> { %s7795_s8 = smov (%p3180_p12, %s3179_s8), 0  ;;  %3173 = sbr.rel (!%p3170_p13) target bundleno = 1343 (0x53f), region = 151 }
 0x543   : >> { %s3317_s7 = sshll.u32 %s7795_s8, 3  ;;  %s5607_s6 = smov %s7795_s8  }
 0x544   : >> { %s3184_s30 = scalar_lea.vmem %s3165_s17, %s3317_s7 [#allocation5]   ;;  %s3185_s26 = scalar_lea.vmem %s3167_s20, %s3317_s7  }
 0x549 PF: > { %p16_p1 = scmp.ge.s32.totalorder %s5675_s24, 4   ;;  %s7784_s20 = smov %s5572_s21 }
 0x54a   : > { %s7785_s21 = smov %s5576_s22  ;;  %s7786_s22 = smov %s5685_s27 }
 0x54b   : > { %s7787_s23 = smov %s5675_s24  ;;  %18 = sbr.rel (!%p16_p1) target bundleno = 5 (0x5), region = 162 }
 0x552   :  { %3201 = vsyncpa [#allocation4], 1 }
 0x553   :  { %3203 = vsyncpa [#allocation4 + $0x1], 1 }

</bundles_post_ra>
